<compile_context>
chip_gen: v7x
topology: tpu7x:2x2x1
jax: 0.10.0
libtpu: 0.0.40
codegen_flags: <defaults>
</compile_context>

<pallas_src>
import functools

import jax
import jax.numpy as jnp
from jax.experimental import pallas as pl
from jax.experimental.pallas import tpu as pltpu


def make_fused_prop_kernel(c_in: int, c_out: int, gdep: int, alpha: float):
    """Fused graph-propagation + 1x1-conv kernel.

    Refs (per grid step (n, j)):
      a_ref : [V, V]           f32 VMEM  row-normalized adjacency (resident)
      w_ref : [C_out, C_in]    f32 SMEM  conv weight (scalar reads)
      b_ref : [C_out]          f32 SMEM  conv bias   (scalar reads)
      x_ref : [C_in, V, T]     f32 VMEM  input tile (batch dim squeezed)
      o_ref : [C_out, V, T]    f32 VMEM  output tile (batch dim squeezed)
    """
    beta = 1.0 - alpha

    def kernel(a_ref, w_ref, b_ref, x_ref, o_ref):
        a = a_ref[...]                                    # [V, V]
        xs = [x_ref[c] for c in range(c_in)]              # C_in x [V, T]
        axs = [alpha * xc for xc in xs]                   # hoisted out of gdep loop
        hs = xs
        for _ in range(gdep):                             # static unroll (small gdep)
            hs = [
                axs[c] + beta * jnp.dot(a, hs[c],
                                        preferred_element_type=jnp.float32,
                                        precision=jax.lax.Precision.HIGHEST)
                for c in range(c_in)
            ]
        # 1x1 conv: out[co] = b[co] + sum_ci W[co, ci] * h[ci]
        # ci-outer / co-inner running accumulators -> each h[ci] tile read once.
        accs = [hs[0] * w_ref[co, 0] for co in range(c_out)]
        for ci in range(1, c_in):
            hci = hs[ci]
            accs = [accs[co] + hci * w_ref[co, ci] for co in range(c_out)]
        for co in range(c_out):
            o_ref[co] = (accs[co] + b_ref[co]).astype(o_ref.dtype)

    return kernel


def _choose_tile_l(L: int, n_batches: int, c_in: int, c_out: int, V: int,
                   vmem_cap: int) -> int:
    """Pick the L-tile width (lane axis). Returns a value that divides L."""
    # Small or non-128-multiple L: use the full dim as the block (allowed by
    # the (8,128) rule) -> no padding, no ragged tail.
    if L < 256 or L % 128 != 0:
        return L
    # Per-L-column f32 bytes in one grid step:
    #   double-buffered x/out streams + live x/h/acc temporaries.
    bytes_per_l = (2 * (c_in + c_out) + (2 * c_in + c_out)) * V * 4
    budget = min(vmem_cap // 2, 40 * 1024 * 1024)         # v7x-safe cap
    tile = min(L, max(128, (budget // max(bytes_per_l, 1)) // 128 * 128))
    while L % tile != 0:                                   # keep blocks even
        tile -= 128
    # Guarantee >= 2 grid steps so the "parallel" axes shard across v7x's 2 TCs.
    if n_batches * (L // tile) < 2 and tile > 128:
        tile = max(128, (tile // 2) // 128 * 128)
        while L % tile != 0:
            tile -= 128
    return tile


def prop_forward(x, adj, conv_w, conv_b, *, gdep: int, alpha: float):
    """x: [N, C_in, V, L], adj: [V, V], conv_w: [C_out, C_in], conv_b: [C_out]."""
    N, C_in, V, L = x.shape
    C_out = conv_w.shape[0]

    # ---- hoisted adjacency normalization (once, outside the kernel) --------
    a = adj.astype(jnp.float32) + jnp.eye(V, dtype=jnp.float32)
    a = a / jnp.sum(a, axis=1, keepdims=True)

    # ---- generation-aware VMEM budget ---------------------------------------
    try:
        vmem_cap = int(pltpu.get_tpu_info().vmem_capacity_bytes)
    except Exception:
        vmem_cap = 64 * 1024 * 1024          # conservative (v7x per-TC VMEM)

    tile_l = _choose_tile_l(L, N, C_in, C_out, V, vmem_cap)
    num_l_tiles = L // tile_l
    grid = (N, num_l_tiles)

    # vmem_limit derived from the actual per-step footprint (+ slack), not a
    # fixed constant; never above physical capacity.
    io_bytes = 2 * (C_in + C_out) * V * tile_l * 4         # double-buffered streams
    live_bytes = (2 * C_in + C_out) * V * tile_l * 4       # x/h/acc temporaries
    vmem_limit = io_bytes + live_bytes + V * V * 4 + (4 << 20)
    vmem_limit = int(min(max(vmem_limit, 16 << 20), vmem_cap))

    flops = N * (2 * gdep * C_in * V * V * L               # propagation matmuls
                 + 2 * gdep * C_in * V * L                 # alpha-blends
                 + 2 * C_out * C_in * V * L)               # 1x1 conv FMAs
    bytes_accessed = 4 * (N * (C_in + C_out) * V * L + V * V
                          + C_out * C_in + C_out)

    x32 = x.astype(jnp.float32)
    w = conv_w.astype(jnp.float32)
    b = conv_b.astype(jnp.float32)

    # TODO(synk): if the acceptance tolerance is ever relaxed, stream x/out as
    # bf16 (keep A + accumulation in f32) to halve HBM bytes.
    ho = pl.pallas_call(
        make_fused_prop_kernel(C_in, C_out, gdep, float(alpha)),
        out_shape=jax.ShapeDtypeStruct((N, C_out, V, L), jnp.float32),
        grid_spec=pltpu.PrefetchScalarGridSpec(
            num_scalar_prefetch=0,
            grid=grid,
            in_specs=[
                pl.BlockSpec((V, V), lambda n, j: (0, 0)),             # A (resident)
                pl.BlockSpec(memory_space=pltpu.MemorySpace.SMEM),     # W (scalars)
                pl.BlockSpec(memory_space=pltpu.MemorySpace.SMEM),     # bias
                pl.BlockSpec((pl.Squeezed(), C_in, V, tile_l),
                             lambda n, j: (n, 0, 0, j)),               # x tile
            ],
            out_specs=pl.BlockSpec((pl.Squeezed(), C_out, V, tile_l),
                                   lambda n, j: (n, 0, 0, j)),
        ),
        compiler_params=pltpu.CompilerParams(
            dimension_semantics=("parallel", "parallel"),
            vmem_limit_bytes=vmem_limit,
        ),
        cost_estimate=pl.CostEstimate(
            flops=flops, transcendentals=0, bytes_accessed=bytes_accessed),
    )(a, w, b, x32)

    return ho   # already in PyTorch layout [N, C_out, V, L]


def prop_reference(x, adj, conv_w, conv_b, *, gdep: int, alpha: float):
    """Pure-JAX mirror of the PyTorch forward, for correctness checking."""
    V = adj.shape[0]
    a = adj + jnp.eye(V, dtype=adj.dtype)
    d = a.sum(1)
    a = a / d[:, None]
    h = x
    for _ in range(gdep):
        h = alpha * x + (1.0 - alpha) * jnp.einsum('ncwl,vw->ncvl', h, a)
    ho = jnp.einsum('ncvl,oc->novl', h, conv_w) + conv_b[None, :, None, None]
    return ho


if __name__ == "__main__":
    # small shapes consistent with the module's forward
    # (V deliberately not a multiple of 8, L < 128 -> full-dim blocks, no padding)
    N, C_in, C_out, V, L = 2, 4, 8, 10, 16
    gdep, alpha = 2, 0.05   # dropout is stored but unused in the forward pass

    key = jax.random.PRNGKey(0)
    kx, ka, kw, kb = jax.random.split(key, 4)
    x = jax.random.normal(kx, (N, C_in, V, L), dtype=jnp.float32)
    adj = jax.random.uniform(ka, (V, V), dtype=jnp.float32)          # non-negative
    conv_w = jax.random.normal(kw, (C_out, C_in), dtype=jnp.float32) * 0.1
    conv_b = jax.random.normal(kb, (C_out,), dtype=jnp.float32) * 0.1

    fwd = jax.jit(functools.partial(prop_forward, gdep=gdep, alpha=alpha))
    ho = fwd(x, adj, conv_w, conv_b)
    ho = jax.block_until_ready(ho)

    ref = prop_reference(x, adj, conv_w, conv_b, gdep=gdep, alpha=alpha)
    assert ho.shape == (N, C_out, V, L), ho.shape
    assert jnp.allclose(ho, ref, atol=1e-4, rtol=1e-4), \
        float(jnp.max(jnp.abs(ho - ref)))

    print("KERNEL_OK")
</pallas_src>

<mosaic_0001>
module attributes {stable_mosaic.version = 11 : i64} {
  func.func @kernel(%arg0: i32, %arg1: i32, %arg2: memref<10x10xf32, #tpu.memory_space<vmem>>, %arg3: memref<8x4xf32, #tpu.memory_space<smem>>, %arg4: memref<8xf32, #tpu.memory_space<smem>>, %arg5: memref<1x4x10x16xf32, #tpu.memory_space<vmem>>, %arg6: memref<1x8x10x16xf32, #tpu.memory_space<vmem>>) attributes {dimension_semantics = [#tpu.dimension_semantics<parallel>, #tpu.dimension_semantics<parallel>], iteration_bounds = array<i64: 2, 1>, scalar_prefetch = 0 : i64, scratch_operands = 0 : i64, tpu.core_type = #tpu.core_type<tc>, window_params = [{pipeline_mode = #tpu.pipeline_mode<synchronous>, transform_indices = @transform_0, window_bounds = array<i64: 10, 10>}, {transform_indices = @transform_1, window_bounds = array<i64: 8, 4>}, {transform_indices = @transform_2, window_bounds = array<i64: 8>}, {transform_indices = @transform_3, window_bounds = array<i64: 1, 4, 10, 16>}, {transform_indices = @transform_4, window_bounds = array<i64: 1, 8, 10, 16>}]} {
    %c0 = arith.constant 0 : index
    %c0_0 = arith.constant 0 : index
    %0 = vector.load %arg2[%c0, %c0_0] : memref<10x10xf32, #tpu.memory_space<vmem>>, vector<10x10xf32>
    %c0_1 = arith.constant 0 : index
    %c0_2 = arith.constant 0 : index
    %c0_3 = arith.constant 0 : index
    %c0_4 = arith.constant 0 : index
    %1 = vector.load %arg5[%c0_1, %c0_2, %c0_3, %c0_4] : memref<1x4x10x16xf32, #tpu.memory_space<vmem>>, vector<1x1x10x16xf32>
    %2 = vector.shape_cast %1 : vector<1x1x10x16xf32> to vector<10x16xf32>
    %c0_5 = arith.constant 0 : index
    %c1 = arith.constant 1 : index
    %c0_6 = arith.constant 0 : index
    %c0_7 = arith.constant 0 : index
    %3 = vector.load %arg5[%c0_5, %c1, %c0_6, %c0_7] : memref<1x4x10x16xf32, #tpu.memory_space<vmem>>, vector<1x1x10x16xf32>
    %4 = vector.shape_cast %3 : vector<1x1x10x16xf32> to vector<10x16xf32>
    %c0_8 = arith.constant 0 : index
    %c2 = arith.constant 2 : index
    %c0_9 = arith.constant 0 : index
    %c0_10 = arith.constant 0 : index
    %5 = vector.load %arg5[%c0_8, %c2, %c0_9, %c0_10] : memref<1x4x10x16xf32, #tpu.memory_space<vmem>>, vector<1x1x10x16xf32>
    %6 = vector.shape_cast %5 : vector<1x1x10x16xf32> to vector<10x16xf32>
    %c0_11 = arith.constant 0 : index
    %c3 = arith.constant 3 : index
    %c0_12 = arith.constant 0 : index
    %c0_13 = arith.constant 0 : index
    %7 = vector.load %arg5[%c0_11, %c3, %c0_12, %c0_13] : memref<1x4x10x16xf32, #tpu.memory_space<vmem>>, vector<1x1x10x16xf32>
    %8 = vector.shape_cast %7 : vector<1x1x10x16xf32> to vector<10x16xf32>
    %cst = arith.constant 5.000000e-02 : f32
    %9 = vector.broadcast %cst : f32 to vector<10x16xf32>
    %10 = arith.mulf %9, %2 : vector<10x16xf32>
    %cst_14 = arith.constant 5.000000e-02 : f32
    %11 = vector.broadcast %cst_14 : f32 to vector<10x16xf32>
    %12 = arith.mulf %11, %4 : vector<10x16xf32>
    %cst_15 = arith.constant 5.000000e-02 : f32
    %13 = vector.broadcast %cst_15 : f32 to vector<10x16xf32>
    %14 = arith.mulf %13, %6 : vector<10x16xf32>
    %cst_16 = arith.constant 5.000000e-02 : f32
    %15 = vector.broadcast %cst_16 : f32 to vector<10x16xf32>
    %16 = arith.mulf %15, %8 : vector<10x16xf32>
    %cst_17 = arith.constant dense<0.000000e+00> : vector<10x16xf32>
    %17 = tpu.matmul %0, %2, %cst_17 {dimension_numbers = #tpu.dot_dimension_numbers<[1], [0], [0], [1], [0, 0, 1, 1], [], []>, precision = #tpu.contract_precision<fp32>} : vector<10x10xf32>, vector<10x16xf32>, vector<10x16xf32> -> vector<10x16xf32>
    %cst_18 = arith.constant 0.949999988 : f32
    %18 = vector.broadcast %cst_18 : f32 to vector<10x16xf32>
    %19 = arith.mulf %18, %17 : vector<10x16xf32>
    %20 = arith.addf %10, %19 : vector<10x16xf32>
    %cst_19 = arith.constant dense<0.000000e+00> : vector<10x16xf32>
    %21 = tpu.matmul %0, %4, %cst_19 {dimension_numbers = #tpu.dot_dimension_numbers<[1], [0], [0], [1], [0, 0, 1, 1], [], []>, precision = #tpu.contract_precision<fp32>} : vector<10x10xf32>, vector<10x16xf32>, vector<10x16xf32> -> vector<10x16xf32>
    %cst_20 = arith.constant 0.949999988 : f32
    %22 = vector.broadcast %cst_20 : f32 to vector<10x16xf32>
    %23 = arith.mulf %22, %21 : vector<10x16xf32>
    %24 = arith.addf %12, %23 : vector<10x16xf32>
    %cst_21 = arith.constant dense<0.000000e+00> : vector<10x16xf32>
    %25 = tpu.matmul %0, %6, %cst_21 {dimension_numbers = #tpu.dot_dimension_numbers<[1], [0], [0], [1], [0, 0, 1, 1], [], []>, precision = #tpu.contract_precision<fp32>} : vector<10x10xf32>, vector<10x16xf32>, vector<10x16xf32> -> vector<10x16xf32>
    %cst_22 = arith.constant 0.949999988 : f32
    %26 = vector.broadcast %cst_22 : f32 to vector<10x16xf32>
    %27 = arith.mulf %26, %25 : vector<10x16xf32>
    %28 = arith.addf %14, %27 : vector<10x16xf32>
    %cst_23 = arith.constant dense<0.000000e+00> : vector<10x16xf32>
    %29 = tpu.matmul %0, %8, %cst_23 {dimension_numbers = #tpu.dot_dimension_numbers<[1], [0], [0], [1], [0, 0, 1, 1], [], []>, precision = #tpu.contract_precision<fp32>} : vector<10x10xf32>, vector<10x16xf32>, vector<10x16xf32> -> vector<10x16xf32>
    %cst_24 = arith.constant 0.949999988 : f32
    %30 = vector.broadcast %cst_24 : f32 to vector<10x16xf32>
    %31 = arith.mulf %30, %29 : vector<10x16xf32>
    %32 = arith.addf %16, %31 : vector<10x16xf32>
    %cst_25 = arith.constant dense<0.000000e+00> : vector<10x16xf32>
    %33 = tpu.matmul %0, %20, %cst_25 {dimension_numbers = #tpu.dot_dimension_numbers<[1], [0], [0], [1], [0, 0, 1, 1], [], []>, precision = #tpu.contract_precision<fp32>} : vector<10x10xf32>, vector<10x16xf32>, vector<10x16xf32> -> vector<10x16xf32>
    %cst_26 = arith.constant 0.949999988 : f32
    %34 = vector.broadcast %cst_26 : f32 to vector<10x16xf32>
    %35 = arith.mulf %34, %33 : vector<10x16xf32>
    %36 = arith.addf %10, %35 : vector<10x16xf32>
    %cst_27 = arith.constant dense<0.000000e+00> : vector<10x16xf32>
    %37 = tpu.matmul %0, %24, %cst_27 {dimension_numbers = #tpu.dot_dimension_numbers<[1], [0], [0], [1], [0, 0, 1, 1], [], []>, precision = #tpu.contract_precision<fp32>} : vector<10x10xf32>, vector<10x16xf32>, vector<10x16xf32> -> vector<10x16xf32>
    %cst_28 = arith.constant 0.949999988 : f32
    %38 = vector.broadcast %cst_28 : f32 to vector<10x16xf32>
    %39 = arith.mulf %38, %37 : vector<10x16xf32>
    %40 = arith.addf %12, %39 : vector<10x16xf32>
    %cst_29 = arith.constant dense<0.000000e+00> : vector<10x16xf32>
    %41 = tpu.matmul %0, %28, %cst_29 {dimension_numbers = #tpu.dot_dimension_numbers<[1], [0], [0], [1], [0, 0, 1, 1], [], []>, precision = #tpu.contract_precision<fp32>} : vector<10x10xf32>, vector<10x16xf32>, vector<10x16xf32> -> vector<10x16xf32>
    %cst_30 = arith.constant 0.949999988 : f32
    %42 = vector.broadcast %cst_30 : f32 to vector<10x16xf32>
    %43 = arith.mulf %42, %41 : vector<10x16xf32>
    %44 = arith.addf %14, %43 : vector<10x16xf32>
    %cst_31 = arith.constant dense<0.000000e+00> : vector<10x16xf32>
    %45 = tpu.matmul %0, %32, %cst_31 {dimension_numbers = #tpu.dot_dimension_numbers<[1], [0], [0], [1], [0, 0, 1, 1], [], []>, precision = #tpu.contract_precision<fp32>} : vector<10x10xf32>, vector<10x16xf32>, vector<10x16xf32> -> vector<10x16xf32>
    %cst_32 = arith.constant 0.949999988 : f32
    %46 = vector.broadcast %cst_32 : f32 to vector<10x16xf32>
    %47 = arith.mulf %46, %45 : vector<10x16xf32>
    %48 = arith.addf %16, %47 : vector<10x16xf32>
    %c0_33 = arith.constant 0 : index
    %c0_34 = arith.constant 0 : index
    %49 = memref.load %arg3[%c0_33, %c0_34] : memref<8x4xf32, #tpu.memory_space<smem>>
    %50 = vector.broadcast %49 : f32 to vector<10x16xf32>
    %51 = arith.mulf %36, %50 : vector<10x16xf32>
    %c1_35 = arith.constant 1 : index
    %c0_36 = arith.constant 0 : index
    %52 = memref.load %arg3[%c1_35, %c0_36] : memref<8x4xf32, #tpu.memory_space<smem>>
    %53 = vector.broadcast %52 : f32 to vector<10x16xf32>
    %54 = arith.mulf %36, %53 : vector<10x16xf32>
    %c2_37 = arith.constant 2 : index
    %c0_38 = arith.constant 0 : index
    %55 = memref.load %arg3[%c2_37, %c0_38] : memref<8x4xf32, #tpu.memory_space<smem>>
    %56 = vector.broadcast %55 : f32 to vector<10x16xf32>
    %57 = arith.mulf %36, %56 : vector<10x16xf32>
    %c3_39 = arith.constant 3 : index
    %c0_40 = arith.constant 0 : index
    %58 = memref.load %arg3[%c3_39, %c0_40] : memref<8x4xf32, #tpu.memory_space<smem>>
    %59 = vector.broadcast %58 : f32 to vector<10x16xf32>
    %60 = arith.mulf %36, %59 : vector<10x16xf32>
    %c4 = arith.constant 4 : index
    %c0_41 = arith.constant 0 : index
    %61 = memref.load %arg3[%c4, %c0_41] : memref<8x4xf32, #tpu.memory_space<smem>>
    %62 = vector.broadcast %61 : f32 to vector<10x16xf32>
    %63 = arith.mulf %36, %62 : vector<10x16xf32>
    %c5 = arith.constant 5 : index
    %c0_42 = arith.constant 0 : index
    %64 = memref.load %arg3[%c5, %c0_42] : memref<8x4xf32, #tpu.memory_space<smem>>
    %65 = vector.broadcast %64 : f32 to vector<10x16xf32>
    %66 = arith.mulf %36, %65 : vector<10x16xf32>
    %c6 = arith.constant 6 : index
    %c0_43 = arith.constant 0 : index
    %67 = memref.load %arg3[%c6, %c0_43] : memref<8x4xf32, #tpu.memory_space<smem>>
    %68 = vector.broadcast %67 : f32 to vector<10x16xf32>
    %69 = arith.mulf %36, %68 : vector<10x16xf32>
    %c7 = arith.constant 7 : index
    %c0_44 = arith.constant 0 : index
    %70 = memref.load %arg3[%c7, %c0_44] : memref<8x4xf32, #tpu.memory_space<smem>>
    %71 = vector.broadcast %70 : f32 to vector<10x16xf32>
    %72 = arith.mulf %36, %71 : vector<10x16xf32>
    %c0_45 = arith.constant 0 : index
    %c1_46 = arith.constant 1 : index
    %73 = memref.load %arg3[%c0_45, %c1_46] : memref<8x4xf32, #tpu.memory_space<smem>>
    %74 = vector.broadcast %73 : f32 to vector<10x16xf32>
    %75 = arith.mulf %40, %74 : vector<10x16xf32>
    %76 = arith.addf %51, %75 : vector<10x16xf32>
    %c1_47 = arith.constant 1 : index
    %c1_48 = arith.constant 1 : index
    %77 = memref.load %arg3[%c1_47, %c1_48] : memref<8x4xf32, #tpu.memory_space<smem>>
    %78 = vector.broadcast %77 : f32 to vector<10x16xf32>
    %79 = arith.mulf %40, %78 : vector<10x16xf32>
    %80 = arith.addf %54, %79 : vector<10x16xf32>
    %c2_49 = arith.constant 2 : index
    %c1_50 = arith.constant 1 : index
    %81 = memref.load %arg3[%c2_49, %c1_50] : memref<8x4xf32, #tpu.memory_space<smem>>
    %82 = vector.broadcast %81 : f32 to vector<10x16xf32>
    %83 = arith.mulf %40, %82 : vector<10x16xf32>
    %84 = arith.addf %57, %83 : vector<10x16xf32>
    %c3_51 = arith.constant 3 : index
    %c1_52 = arith.constant 1 : index
    %85 = memref.load %arg3[%c3_51, %c1_52] : memref<8x4xf32, #tpu.memory_space<smem>>
    %86 = vector.broadcast %85 : f32 to vector<10x16xf32>
    %87 = arith.mulf %40, %86 : vector<10x16xf32>
    %88 = arith.addf %60, %87 : vector<10x16xf32>
    %c4_53 = arith.constant 4 : index
    %c1_54 = arith.constant 1 : index
    %89 = memref.load %arg3[%c4_53, %c1_54] : memref<8x4xf32, #tpu.memory_space<smem>>
    %90 = vector.broadcast %89 : f32 to vector<10x16xf32>
    %91 = arith.mulf %40, %90 : vector<10x16xf32>
    %92 = arith.addf %63, %91 : vector<10x16xf32>
    %c5_55 = arith.constant 5 : index
    %c1_56 = arith.constant 1 : index
    %93 = memref.load %arg3[%c5_55, %c1_56] : memref<8x4xf32, #tpu.memory_space<smem>>
    %94 = vector.broadcast %93 : f32 to vector<10x16xf32>
    %95 = arith.mulf %40, %94 : vector<10x16xf32>
    %96 = arith.addf %66, %95 : vector<10x16xf32>
    %c6_57 = arith.constant 6 : index
    %c1_58 = arith.constant 1 : index
    %97 = memref.load %arg3[%c6_57, %c1_58] : memref<8x4xf32, #tpu.memory_space<smem>>
    %98 = vector.broadcast %97 : f32 to vector<10x16xf32>
    %99 = arith.mulf %40, %98 : vector<10x16xf32>
    %100 = arith.addf %69, %99 : vector<10x16xf32>
    %c7_59 = arith.constant 7 : index
    %c1_60 = arith.constant 1 : index
    %101 = memref.load %arg3[%c7_59, %c1_60] : memref<8x4xf32, #tpu.memory_space<smem>>
    %102 = vector.broadcast %101 : f32 to vector<10x16xf32>
    %103 = arith.mulf %40, %102 : vector<10x16xf32>
    %104 = arith.addf %72, %103 : vector<10x16xf32>
    %c0_61 = arith.constant 0 : index
    %c2_62 = arith.constant 2 : index
    %105 = memref.load %arg3[%c0_61, %c2_62] : memref<8x4xf32, #tpu.memory_space<smem>>
    %106 = vector.broadcast %105 : f32 to vector<10x16xf32>
    %107 = arith.mulf %44, %106 : vector<10x16xf32>
    %108 = arith.addf %76, %107 : vector<10x16xf32>
    %c1_63 = arith.constant 1 : index
    %c2_64 = arith.constant 2 : index
    %109 = memref.load %arg3[%c1_63, %c2_64] : memref<8x4xf32, #tpu.memory_space<smem>>
    %110 = vector.broadcast %109 : f32 to vector<10x16xf32>
    %111 = arith.mulf %44, %110 : vector<10x16xf32>
    %112 = arith.addf %80, %111 : vector<10x16xf32>
    %c2_65 = arith.constant 2 : index
    %c2_66 = arith.constant 2 : index
    %113 = memref.load %arg3[%c2_65, %c2_66] : memref<8x4xf32, #tpu.memory_space<smem>>
    %114 = vector.broadcast %113 : f32 to vector<10x16xf32>
    %115 = arith.mulf %44, %114 : vector<10x16xf32>
    %116 = arith.addf %84, %115 : vector<10x16xf32>
    %c3_67 = arith.constant 3 : index
    %c2_68 = arith.constant 2 : index
    %117 = memref.load %arg3[%c3_67, %c2_68] : memref<8x4xf32, #tpu.memory_space<smem>>
    %118 = vector.broadcast %117 : f32 to vector<10x16xf32>
    %119 = arith.mulf %44, %118 : vector<10x16xf32>
    %120 = arith.addf %88, %119 : vector<10x16xf32>
    %c4_69 = arith.constant 4 : index
    %c2_70 = arith.constant 2 : index
    %121 = memref.load %arg3[%c4_69, %c2_70] : memref<8x4xf32, #tpu.memory_space<smem>>
    %122 = vector.broadcast %121 : f32 to vector<10x16xf32>
    %123 = arith.mulf %44, %122 : vector<10x16xf32>
    %124 = arith.addf %92, %123 : vector<10x16xf32>
    %c5_71 = arith.constant 5 : index
    %c2_72 = arith.constant 2 : index
    %125 = memref.load %arg3[%c5_71, %c2_72] : memref<8x4xf32, #tpu.memory_space<smem>>
    %126 = vector.broadcast %125 : f32 to vector<10x16xf32>
    %127 = arith.mulf %44, %126 : vector<10x16xf32>
    %128 = arith.addf %96, %127 : vector<10x16xf32>
    %c6_73 = arith.constant 6 : index
    %c2_74 = arith.constant 2 : index
    %129 = memref.load %arg3[%c6_73, %c2_74] : memref<8x4xf32, #tpu.memory_space<smem>>
    %130 = vector.broadcast %129 : f32 to vector<10x16xf32>
    %131 = arith.mulf %44, %130 : vector<10x16xf32>
    %132 = arith.addf %100, %131 : vector<10x16xf32>
    %c7_75 = arith.constant 7 : index
    %c2_76 = arith.constant 2 : index
    %133 = memref.load %arg3[%c7_75, %c2_76] : memref<8x4xf32, #tpu.memory_space<smem>>
    %134 = vector.broadcast %133 : f32 to vector<10x16xf32>
    %135 = arith.mulf %44, %134 : vector<10x16xf32>
    %136 = arith.addf %104, %135 : vector<10x16xf32>
    %c0_77 = arith.constant 0 : index
    %c3_78 = arith.constant 3 : index
    %137 = memref.load %arg3[%c0_77, %c3_78] : memref<8x4xf32, #tpu.memory_space<smem>>
    %138 = vector.broadcast %137 : f32 to vector<10x16xf32>
    %139 = arith.mulf %48, %138 : vector<10x16xf32>
    %140 = arith.addf %108, %139 : vector<10x16xf32>
    %c1_79 = arith.constant 1 : index
    %c3_80 = arith.constant 3 : index
    %141 = memref.load %arg3[%c1_79, %c3_80] : memref<8x4xf32, #tpu.memory_space<smem>>
    %142 = vector.broadcast %141 : f32 to vector<10x16xf32>
    %143 = arith.mulf %48, %142 : vector<10x16xf32>
    %144 = arith.addf %112, %143 : vector<10x16xf32>
    %c2_81 = arith.constant 2 : index
    %c3_82 = arith.constant 3 : index
    %145 = memref.load %arg3[%c2_81, %c3_82] : memref<8x4xf32, #tpu.memory_space<smem>>
    %146 = vector.broadcast %145 : f32 to vector<10x16xf32>
    %147 = arith.mulf %48, %146 : vector<10x16xf32>
    %148 = arith.addf %116, %147 : vector<10x16xf32>
    %c3_83 = arith.constant 3 : index
    %c3_84 = arith.constant 3 : index
    %149 = memref.load %arg3[%c3_83, %c3_84] : memref<8x4xf32, #tpu.memory_space<smem>>
    %150 = vector.broadcast %149 : f32 to vector<10x16xf32>
    %151 = arith.mulf %48, %150 : vector<10x16xf32>
    %152 = arith.addf %120, %151 : vector<10x16xf32>
    %c4_85 = arith.constant 4 : index
    %c3_86 = arith.constant 3 : index
    %153 = memref.load %arg3[%c4_85, %c3_86] : memref<8x4xf32, #tpu.memory_space<smem>>
    %154 = vector.broadcast %153 : f32 to vector<10x16xf32>
    %155 = arith.mulf %48, %154 : vector<10x16xf32>
    %156 = arith.addf %124, %155 : vector<10x16xf32>
    %c5_87 = arith.constant 5 : index
    %c3_88 = arith.constant 3 : index
    %157 = memref.load %arg3[%c5_87, %c3_88] : memref<8x4xf32, #tpu.memory_space<smem>>
    %158 = vector.broadcast %157 : f32 to vector<10x16xf32>
    %159 = arith.mulf %48, %158 : vector<10x16xf32>
    %160 = arith.addf %128, %159 : vector<10x16xf32>
    %c6_89 = arith.constant 6 : index
    %c3_90 = arith.constant 3 : index
    %161 = memref.load %arg3[%c6_89, %c3_90] : memref<8x4xf32, #tpu.memory_space<smem>>
    %162 = vector.broadcast %161 : f32 to vector<10x16xf32>
    %163 = arith.mulf %48, %162 : vector<10x16xf32>
    %164 = arith.addf %132, %163 : vector<10x16xf32>
    %c7_91 = arith.constant 7 : index
    %c3_92 = arith.constant 3 : index
    %165 = memref.load %arg3[%c7_91, %c3_92] : memref<8x4xf32, #tpu.memory_space<smem>>
    %166 = vector.broadcast %165 : f32 to vector<10x16xf32>
    %167 = arith.mulf %48, %166 : vector<10x16xf32>
    %168 = arith.addf %136, %167 : vector<10x16xf32>
    %c0_93 = arith.constant 0 : index
    %169 = memref.load %arg4[%c0_93] : memref<8xf32, #tpu.memory_space<smem>>
    %170 = vector.broadcast %169 : f32 to vector<10x16xf32>
    %171 = arith.addf %140, %170 : vector<10x16xf32>
    %c0_94 = arith.constant 0 : index
    %c0_95 = arith.constant 0 : index
    %c0_96 = arith.constant 0 : index
    %c0_97 = arith.constant 0 : index
    %172 = vector.load %arg6[%c0_94, %c0_95, %c0_96, %c0_97] : memref<1x8x10x16xf32, #tpu.memory_space<vmem>>, vector<1x1x10x16xf32>
    %173 = vector.shape_cast %172 : vector<1x1x10x16xf32> to vector<10x16xf32>
    %174 = vector.shape_cast %171 : vector<10x16xf32> to vector<1x1x10x16xf32>
    tpu.vector_store %arg6[%c0_94, %c0_95, %c0_96, %c0_97], %174 {strides = array<i32>} : memref<1x8x10x16xf32, #tpu.memory_space<vmem>>, vector<1x1x10x16xf32>,
    %c1_98 = arith.constant 1 : index
    %175 = memref.load %arg4[%c1_98] : memref<8xf32, #tpu.memory_space<smem>>
    %176 = vector.broadcast %175 : f32 to vector<10x16xf32>
    %177 = arith.addf %144, %176 : vector<10x16xf32>
    %c0_99 = arith.constant 0 : index
    %c1_100 = arith.constant 1 : index
    %c0_101 = arith.constant 0 : index
    %c0_102 = arith.constant 0 : index
    %178 = vector.load %arg6[%c0_99, %c1_100, %c0_101, %c0_102] : memref<1x8x10x16xf32, #tpu.memory_space<vmem>>, vector<1x1x10x16xf32>
    %179 = vector.shape_cast %178 : vector<1x1x10x16xf32> to vector<10x16xf32>
    %180 = vector.shape_cast %177 : vector<10x16xf32> to vector<1x1x10x16xf32>
    tpu.vector_store %arg6[%c0_99, %c1_100, %c0_101, %c0_102], %180 {strides = array<i32>} : memref<1x8x10x16xf32, #tpu.memory_space<vmem>>, vector<1x1x10x16xf32>,
    %c2_103 = arith.constant 2 : index
    %181 = memref.load %arg4[%c2_103] : memref<8xf32, #tpu.memory_space<smem>>
    %182 = vector.broadcast %181 : f32 to vector<10x16xf32>
    %183 = arith.addf %148, %182 : vector<10x16xf32>
    %c0_104 = arith.constant 0 : index
    %c2_105 = arith.constant 2 : index
    %c0_106 = arith.constant 0 : index
    %c0_107 = arith.constant 0 : index
    %184 = vector.load %arg6[%c0_104, %c2_105, %c0_106, %c0_107] : memref<1x8x10x16xf32, #tpu.memory_space<vmem>>, vector<1x1x10x16xf32>
    %185 = vector.shape_cast %184 : vector<1x1x10x16xf32> to vector<10x16xf32>
    %186 = vector.shape_cast %183 : vector<10x16xf32> to vector<1x1x10x16xf32>
    tpu.vector_store %arg6[%c0_104, %c2_105, %c0_106, %c0_107], %186 {strides = array<i32>} : memref<1x8x10x16xf32, #tpu.memory_space<vmem>>, vector<1x1x10x16xf32>,
    %c3_108 = arith.constant 3 : index
    %187 = memref.load %arg4[%c3_108] : memref<8xf32, #tpu.memory_space<smem>>
    %188 = vector.broadcast %187 : f32 to vector<10x16xf32>
    %189 = arith.addf %152, %188 : vector<10x16xf32>
    %c0_109 = arith.constant 0 : index
    %c3_110 = arith.constant 3 : index
    %c0_111 = arith.constant 0 : index
    %c0_112 = arith.constant 0 : index
    %190 = vector.load %arg6[%c0_109, %c3_110, %c0_111, %c0_112] : memref<1x8x10x16xf32, #tpu.memory_space<vmem>>, vector<1x1x10x16xf32>
    %191 = vector.shape_cast %190 : vector<1x1x10x16xf32> to vector<10x16xf32>
    %192 = vector.shape_cast %189 : vector<10x16xf32> to vector<1x1x10x16xf32>
    tpu.vector_store %arg6[%c0_109, %c3_110, %c0_111, %c0_112], %192 {strides = array<i32>} : memref<1x8x10x16xf32, #tpu.memory_space<vmem>>, vector<1x1x10x16xf32>,
    %c4_113 = arith.constant 4 : index
    %193 = memref.load %arg4[%c4_113] : memref<8xf32, #tpu.memory_space<smem>>
    %194 = vector.broadcast %193 : f32 to vector<10x16xf32>
    %195 = arith.addf %156, %194 : vector<10x16xf32>
    %c0_114 = arith.constant 0 : index
    %c4_115 = arith.constant 4 : index
    %c0_116 = arith.constant 0 : index
    %c0_117 = arith.constant 0 : index
    %196 = vector.load %arg6[%c0_114, %c4_115, %c0_116, %c0_117] : memref<1x8x10x16xf32, #tpu.memory_space<vmem>>, vector<1x1x10x16xf32>
    %197 = vector.shape_cast %196 : vector<1x1x10x16xf32> to vector<10x16xf32>
    %198 = vector.shape_cast %195 : vector<10x16xf32> to vector<1x1x10x16xf32>
    tpu.vector_store %arg6[%c0_114, %c4_115, %c0_116, %c0_117], %198 {strides = array<i32>} : memref<1x8x10x16xf32, #tpu.memory_space<vmem>>, vector<1x1x10x16xf32>,
    %c5_118 = arith.constant 5 : index
    %199 = memref.load %arg4[%c5_118] : memref<8xf32, #tpu.memory_space<smem>>
    %200 = vector.broadcast %199 : f32 to vector<10x16xf32>
    %201 = arith.addf %160, %200 : vector<10x16xf32>
    %c0_119 = arith.constant 0 : index
    %c5_120 = arith.constant 5 : index
    %c0_121 = arith.constant 0 : index
    %c0_122 = arith.constant 0 : index
    %202 = vector.load %arg6[%c0_119, %c5_120, %c0_121, %c0_122] : memref<1x8x10x16xf32, #tpu.memory_space<vmem>>, vector<1x1x10x16xf32>
    %203 = vector.shape_cast %202 : vector<1x1x10x16xf32> to vector<10x16xf32>
    %204 = vector.shape_cast %201 : vector<10x16xf32> to vector<1x1x10x16xf32>
    tpu.vector_store %arg6[%c0_119, %c5_120, %c0_121, %c0_122], %204 {strides = array<i32>} : memref<1x8x10x16xf32, #tpu.memory_space<vmem>>, vector<1x1x10x16xf32>,
    %c6_123 = arith.constant 6 : index
    %205 = memref.load %arg4[%c6_123] : memref<8xf32, #tpu.memory_space<smem>>
    %206 = vector.broadcast %205 : f32 to vector<10x16xf32>
    %207 = arith.addf %164, %206 : vector<10x16xf32>
    %c0_124 = arith.constant 0 : index
    %c6_125 = arith.constant 6 : index
    %c0_126 = arith.constant 0 : index
    %c0_127 = arith.constant 0 : index
    %208 = vector.load %arg6[%c0_124, %c6_125, %c0_126, %c0_127] : memref<1x8x10x16xf32, #tpu.memory_space<vmem>>, vector<1x1x10x16xf32>
    %209 = vector.shape_cast %208 : vector<1x1x10x16xf32> to vector<10x16xf32>
    %210 = vector.shape_cast %207 : vector<10x16xf32> to vector<1x1x10x16xf32>
    tpu.vector_store %arg6[%c0_124, %c6_125, %c0_126, %c0_127], %210 {strides = array<i32>} : memref<1x8x10x16xf32, #tpu.memory_space<vmem>>, vector<1x1x10x16xf32>,
    %c7_128 = arith.constant 7 : index
    %211 = memref.load %arg4[%c7_128] : memref<8xf32, #tpu.memory_space<smem>>
    %212 = vector.broadcast %211 : f32 to vector<10x16xf32>
    %213 = arith.addf %168, %212 : vector<10x16xf32>
    %c0_129 = arith.constant 0 : index
    %c7_130 = arith.constant 7 : index
    %c0_131 = arith.constant 0 : index
    %c0_132 = arith.constant 0 : index
    %214 = vector.load %arg6[%c0_129, %c7_130, %c0_131, %c0_132] : memref<1x8x10x16xf32, #tpu.memory_space<vmem>>, vector<1x1x10x16xf32>
    %215 = vector.shape_cast %214 : vector<1x1x10x16xf32> to vector<10x16xf32>
    %216 = vector.shape_cast %213 : vector<10x16xf32> to vector<1x1x10x16xf32>
    tpu.vector_store %arg6[%c0_129, %c7_130, %c0_131, %c0_132], %216 {strides = array<i32>} : memref<1x8x10x16xf32, #tpu.memory_space<vmem>>, vector<1x1x10x16xf32>,
    return
  }
  func.func @transform_0(%arg0: i32, %arg1: i32) -> (i32, i32) {
    %c0_i32 = arith.constant 0 : i32
    %c0_i32_0 = arith.constant 0 : i32
    %c0_i32_1 = arith.constant 0 : i32
    return %c0_i32, %c0_i32_0 : i32, i32
  }
  func.func @transform_1(%arg0: i32, %arg1: i32) -> (i32, i32) {
    %c0_i32 = arith.constant 0 : i32
    %c0_i32_0 = arith.constant 0 : i32
    %c0_i32_1 = arith.constant 0 : i32
    return %c0_i32, %c0_i32_0 : i32, i32
  }
  func.func @transform_2(%arg0: i32, %arg1: i32) -> i32 {
    %c0_i32 = arith.constant 0 : i32
    %c0_i32_0 = arith.constant 0 : i32
    return %c0_i32 : i32
  }
  func.func @transform_3(%arg0: i32, %arg1: i32) -> (i32, i32, i32, i32) {
    %c0_i32 = arith.constant 0 : i32
    %c0_i32_0 = arith.constant 0 : i32
    %c0_i32_1 = arith.constant 0 : i32
    return %arg0, %c0_i32, %c0_i32_0, %arg1 : i32, i32, i32, i32
  }
  func.func @transform_4(%arg0: i32, %arg1: i32) -> (i32, i32, i32, i32) {
    %c0_i32 = arith.constant 0 : i32
    %c0_i32_0 = arith.constant 0 : i32
    %c0_i32_1 = arith.constant 0 : i32
    return %arg0, %c0_i32, %c0_i32_0, %arg1 : i32, i32, i32, i32
  }
}

</mosaic_0001>

<bundles_post_ra>
// kernel: prop_forward.1
= control target key start
LH: loop header
LB: loop body
LE: loop exit
PB: predicated region body
PF: predicated region fallthrough
CT: control target
= control target key end

     0   :  { %s6366_s0 = inlined_call_operand.vmem [shape: f32[10,10], index: 0, kind: input, shape index: {}]   ;;  %s6367_s1 = inlined_call_operand.vmem [shape: f32[8,4], index: 1, kind: input, shape index: {}]   ;;  %s6368_s2 = inlined_call_operand.vmem [shape: f32[8], index: 2, kind: input, shape index: {}]   ;;  %s6369_s3 = inlined_call_operand.vmem [shape: f32[2,4,10,16], index: 3, kind: input, shape index: {}]   ;;  %s6370_s4 = inlined_call_operand.vmem [shape: f32[2,8,10,16], index: 4, kind: output, shape index: {}]  }
   0x1   :  { %6374 = sst [smem:[#allocation9_spill]] %s6366_s0 }
   0x2   :  { %6375 = sst [smem:[#allocation10_spill]] %s6367_s1 }
   0x3   :  { %6376 = sst [smem:[#allocation11_spill]] %s6368_s2 }
   0x4   :  { %6377 = sst [smem:[#allocation12_spill]] %s6369_s3 }
   0x5   :  { %9 = vsyncpa [#allocation3], 0 }
   0x6   :  { %10 = vsyncpa [#allocation5], 0  ;;  %s5705_s15 = smov 0   ;;  %s5707_s16 = smov 0  }
   0x7   :  { %s5709_s17 = smov 0  }
   0x8 LB: > { %s4696_s18 = sadd.s32 4294967295, %s5676_s17   ;;  %s28_s19 = sadd.s32 1, %s5672_s16  ;;  %s5676_s17 = sphi %s5709_s17, %s16_s17   ;;  %s5672_s16 = sphi %s5707_s16, %s6390_s16   ;;  %s5668_s15 = sphi %s5705_s15, %s6389_s15  }
   0x9   : > { %p30_p0 = scmp.ge.s32.totalorder %s28_s19, 2  ;;  %p4698_p1 = scmp.ge.s32.totalorder %s5676_s17, 1 }
   0xa   : > { %p152_p2 = scmp.lt.s32.totalorder %s5676_s17, 3  ;;  %p5730_p4 = scmp.eq.s32.totalorder %s4696_s18, 0 }
   0xb   : > { %s6392_s19 = smov (%p30_p0, %s28_s19), 0  ;;  %s6381_s1 = sld [smem:[#allocation10_spill]] }
   0xc   : > { %6378 = sst [smem:[#allocation8_spill]] %s6392_s19  ;;  %p5726_p3 = pnand %p4698_p1, %p152_p2 }
   0xd   : > { %s6380_s21 = scalar_select %p5730_p4, 1, 0 }
   0xe   : > { %s6379_s20 = scalar_select %p5726_p3, 1, 0 }
   0xf   : > { %p5579_p5 = pneg %p5726_p3  ;;  %s6382_s2 = sld [smem:[#allocation11_spill]] }
  0x11   : > { %s168_s24 = sshll.u32 %s6381_s1, 4  ;;  %p5744_p6 = pnand %p5730_p4, %p5579_p5  ;;  %s169_s24 = int_to_ptr.vmem [resolvable:$true] %s168_s24 }
  0x12   : > { %s5616_s29 = scalar_lea.vmem %s169_s24, 128  ;;  %p5624_p11 = scmp.lt.s32.totalorder %s169_s24, %s169_s24 }
  0x13   : > { %p5617_p7 = scmp.ne.s32.totalorder %s169_s24, %s5616_s29  ;;  %p5618_p8 = pneg %p5744_p6 }
  0x14   : > { %p5625_p12 = scmp.lt.s32.totalorder %s5616_s29, %s5616_s29 }
  0x15   : > { %s179_s27 = sshll.u32 %s6382_s2, 4  ;;  %p5619_p9 = pnand %p5618_p8, %p5617_p7  ;;  %s180_s27 = int_to_ptr.vmem [resolvable:$true] %s179_s27 }
  0x16   : > { %p5626_p13 = por %p5625_p12, %p5624_p11 }
  0x17   : > { %p5620_p10 = pneg %p5619_p9 }
  0x19   : > { %p5627_p0 = pnand %p5626_p13, %p5620_p10 }
  0x1b   : > { %5630 = shalt.err (!%p5627_p0)
}
  0x1c   : > { %s5678_s30 = smov [#allocation2]   ;;  %s5631_s5 = scalar_lea.vmem %s180_s27, 16 }
  0x1d   : > { %5582 = dma.vmem_to_smem (!%p5744_p6), %s169_s24, 128, %s5678_s30, [#allocation3]  }
  0x1e   : > { %p5632_p1 = scmp.ne.s32.totalorder %s180_s27, %s5631_s5  ;;  %p5639_p4 = scmp.lt.s32.totalorder %s180_s27, %s180_s27 }
  0x1f   : > { %p5640_p3 = scmp.lt.s32.totalorder %s5631_s5, %s5631_s5 }
  0x20   : > { %p5634_p2 = pnand %p5632_p1, %p5618_p8 }
  0x21   : > { %p5641_p7 = por %p5640_p3, %p5639_p4 }
  0x22   : > { %p5635_p5 = pneg %p5634_p2 }
  0x24   : > { %p5642_p9 = pnand %p5641_p7, %p5635_p5 }
  0x26   : > { %5645 = shalt.err (!%p5642_p9)
}
  0x27   : > { %s5679_s6 = smov [#allocation4]   ;;  %p6384_p10 = scmp.ne.s32.totalorder %s6379_s20, 0 }
  0x28   : > { %5585 = dma.vmem_to_smem (!%p5744_p6), %s180_s27, 16, %s5679_s6, [#allocation5]  }
  0x29   : > { %203 = sbr.rel (%p6384_p10) target bundleno = 663 (0x297), region = 36  ;;  %p6385_p11 = scmp.ne.s32.totalorder (!%p6384_p10), %s6380_s21, 0 }
  0x30   : > { %5659 = dma.done.wait (%p6385_p11), [#allocation3], 128  }
  0x31   : > { %5661 = vsyncadd (%p6385_p11), [#allocation3], 4294967168 }
  0x32   : > { %5663 = dma.done.wait (%p6385_p11), [#allocation5], 16  }
  0x33   : > { %5665 = vsyncadd (%p6385_p11), [#allocation5], 4294967280 }
  0x34   : > { %213 = sfence }
  0x35   : > { %p240_p3 = scmp.lt.s32.totalorder %s5668_s15, 1  ;;  %s6386_s0 = sld [smem:[#allocation9_spill]]  ;;  %vm277_vm0 = vcmask 80896   ;;  %vm284_vm1 = vcmask 1041408   ;;  %vm4539_vm2 = vcmask 123904   ;;  %vm4537_vm3 = vcmask 130048  }
  0x36   : > { %s6387_s3 = sld [smem:[#allocation12_spill]]  ;;  %s6037_s18 = sld [smem:[#allocation2]] }
  0x37   : > { %s6394_s15 = smov (!%p240_p3, %s5668_s15), 1  ;;  %s6039_s20 = sld [smem:[#allocation2 + $0x80]] }
  0x38   : > { %s4769_s11 = sshll.u32 %s6394_s15, 6  ;;  %s6041_s21 = sld [smem:[#allocation2 + $0x100]] }
  0x39   : > { %s6043_s22 = sld [smem:[#allocation2 + $0x180]]  ;;  %s6053_s27 = sld [smem:[#allocation2 + $0x1]] }
  0x3a   : > { %s6045_s23 = sld [smem:[#allocation2 + $0x200]]  ;;  %s6055_s28 = sld [smem:[#allocation2 + $0x81]] }
  0x3b   : > { %v256_v0 = vld [vmem:[%s6386_s0] sm:$0xff]  ;;  %v257_v1 = vld [vmem:[%s6386_s0 + $0x8] sm:$0x3]  ;;  %s6047_s24 = sld [smem:[#allocation2 + $0x280]]  ;;  %s6057_s29 = sld [smem:[#allocation2 + $0x101]] }
  0x3c   : > { %v279_v2 = vsel %vm277_vm0, %v256_v0, 0  ;;  %v282_v3 = vsel %vm277_vm0, %v257_v1, 0  ;;  %s5788_s14 = scalar_lea.vmem %s6387_s3, %s4769_s11  ;;  %s6049_s25 = sld [smem:[#allocation2 + $0x300]] }
  0x3d   : > { %v5774_v4 = vand.u32 4294901760, %v279_v2  ;;  %v5776_v5 = vand.u32 4294901760, %v282_v3  ;;  %v5791_v8 = vld [vmem:[%s5788_s14] sm:$0xff]  ;;  %v5794_v9 = vld [vmem:[%s5788_s14 + $0x8] sm:$0x3]  ;;  %v5797_v10 = vld [vmem:[%s5788_s14 + $0x10] sm:$0xff] }
  0x3e   : > { %v286_v13 = vsel %vm284_vm1, %v5794_v9, 0  ;;  %v289_v14 = vand.u32 4294901760, %v5791_v8  ;;  %v5809_v15 = vld [vmem:[%s5788_s14 + $0x18] sm:$0x3]  ;;  %v798_v16 = vand.u32 4294901760, %v5797_v10  ;;  %v5852_v50 = vld [vmem:[%s5788_s14 + $0x20] sm:$0xff] }
  0x3f   : > { %v5780_v6 = vsub.f32 %v279_v2, %v5774_v4  ;;  %v5783_v7 = vsub.f32 %v282_v3, %v5776_v5  ;;  %v292_v17 = vand.u32 4294901760, %v286_v13  ;;  %v795_v18 = vsel %vm284_vm1, %v5809_v15, 0  ;;  %v5845_v46 = vld [vmem:[%s5788_s14 + $0x28] sm:$0x3]  ;;  %v5848_v47 = vld [vmem:[%s5788_s14 + $0x38] sm:$0x3] }
  0x40   : > { %v801_v21 = vand.u32 4294901760, %v795_v18  ;;  %v377_v22 = vsub.f32 %v5791_v8, %v289_v14  ;;  %v886_v23 = vsub.f32 %v5797_v10, %v798_v16  ;;  %v1304_v51 = vsel %vm284_vm1, %v5845_v46, 0  ;;  %v5859_v52 = vld [vmem:[%s5788_s14 + $0x30] sm:$0xff]  ;;  %s6051_s26 = sld [smem:[#allocation2 + $0x380]]  ;;  %s6059_s30 = sld [smem:[#allocation2 + $0x181]] }
  0x41   : > { %v5800_v11 = vand.u32 4294901760, %v5780_v6  ;;  %v5803_v12 = vand.u32 4294901760, %v5783_v7  ;;  %v5820_v24 = vpack.c.bf16 %v292_v17, %v289_v14  ;;  %v384_v26 = vsub.f32 %v286_v13, %v292_v17  ;;  %s6061_s5 = sld [smem:[#allocation2 + $0x201]]  ;;  %s6121_s9 = sld [smem:[#allocation2 + $0x2]] }
  0x42   : > { %v5824_v27 = vpack.c.bf16 %v801_v21, %v798_v16  ;;  %v378_v28 = vand.u32 4294901760, %v377_v22  ;;  %v887_v29 = vand.u32 4294901760, %v886_v23  ;;  %v893_v30 = vsub.f32 %v795_v18, %v801_v21  ;;  %s6063_s6 = sld [smem:[#allocation2 + $0x281]]  ;;  %s6123_s10 = sld [smem:[#allocation2 + $0x82]] }
  0x43   : > { %v358_v19 = vsub.f32 %v5780_v6, %v5800_v11  ;;  %v368_v20 = vsub.f32 %v5783_v7, %v5803_v12  ;;  %5300 = vmatprep.subr.bf16.mxu0 %v5820_v24  ;;  %v385_v32 = vand.u32 4294901760, %v384_v26  ;;  %v5307_v43 = vpack.c.bf16 %v384_v26, %v377_v22  ;;  %s6065_s7 = sld [smem:[#allocation2 + $0x301]]  ;;  %s6125_s11 = sld [smem:[#allocation2 + $0x102]] }
  0x44   : > { %5324 = vmatprep.subr.bf16.mxu1 %v5824_v27  ;;  %5302 = vmatpush3.bf16.msra.mxu0 %v5820_v24  ;;  %v379_v33 = vsub.f32 %v377_v22, %v378_v28  ;;  %v888_v34 = vsub.f32 %v886_v23, %v887_v29  ;;  %v894_v35 = vand.u32 4294901760, %v893_v30  ;;  %v5331_v45 = vpack.c.bf16 %v893_v30, %v886_v23  ;;  %s6067_s8 = sld [smem:[#allocation2 + $0x381]]  ;;  %s6127_s12 = sld [smem:[#allocation2 + $0x182]] }
  0x45   : > { %v5822_v25 = vand.u32 4294901760, %v358_v19  ;;  %v5828_v31 = vand.u32 4294901760, %v368_v20  ;;  %5326 = vmatpush3.bf16.msra.mxu1 %v5824_v27  ;;  %v386_v36 = vsub.f32 %v384_v26, %v385_v32  ;;  %v5315_v48 = vpack.c.bf16 %v385_v32, %v378_v28  ;;  %s6129_s13 = sld [smem:[#allocation2 + $0x202]]  ;;  %s6165_s0 = sld [smem:[#allocation4 + $0x6]] }
  0x46   : > { %v380_v37 = vand.u32 4294901760, %v379_v33  ;;  %v889_v38 = vand.u32 4294901760, %v888_v34  ;;  %v895_v39 = vsub.f32 %v893_v30, %v894_v35  ;;  %v5339_v49 = vpack.c.bf16 %v894_v35, %v887_v29  ;;  %s6131_s14 = sld [smem:[#allocation2 + $0x282]]  ;;  %s6167_s1 = sld [smem:[#allocation4 + $0x7]] }
  0x47   : > { %4967 = vmatprep.mubr.f32.mxu0 %v5822_v25  ;;  %5009 = vmatprep.mubr.f32.mxu1 %v5822_v25  ;;  %v387_v40 = vand.u32 4294901760, %v386_v36  ;;  %v1813_v53 = vsel %vm284_vm1, %v5848_v47, 0  ;;  %v1307_v54 = vand.u32 4294901760, %v5852_v50  ;;  %v1310_v55 = vand.u32 4294901760, %v1304_v51  ;;  %s4770_s2 = sshll.u32 %s6394_s15, 7 }
  0x48   : > { %4968 = vmatmul.mubr.f32.vlgmr.msra.gmra.mrb[0].mxu0 %v5828_v31  ;;  %5010 = vmatmul.mubr.f32.vlgmr.msra.gmra.mrb[0].mxu1 %v5828_v31  ;;  %v896_v41 = vand.u32 4294901760, %v895_v39  ;;  %v1816_v56 = vand.u32 4294901760, %v5859_v52  ;;  %v1819_v57 = vand.u32 4294901760, %v1813_v53  ;;  %v5924_v29 = vmul.f32 0.05, %v5794_v9  ;;  %s6243_s19 = scalar_lea.vmem %s6370_s4, %s4770_s2 }
  0x49   : > { %4974 = vmatprep.mubr.f32.mxu0 %v5774_v4  ;;  %v5303_v42 = vpack.c.bf16 %v387_v40, %v380_v37  ;;  %5016 = vmatprep.mubr.f32.mxu1 %v5774_v4  ;;  %v5869_v58 = vsub.f32 %v5852_v50, %v1307_v54  ;;  %v1402_v59 = vsub.f32 %v1304_v51, %v1310_v55  ;;  %v5927_v32 = vmul.f32 0.05, %v5809_v15 }
  0x4a   : > { %v5327_v44 = vpack.c.bf16 %v896_v41, %v889_v38  ;;  %v1904_v60 = vsub.f32 %v5859_v52, %v1816_v56  ;;  %v1911_v61 = vsub.f32 %v1813_v53, %v1819_v57  ;;  %v5879_v2 = vpack.c.bf16 %v1310_v55, %v1307_v54 }
  0x4b   : > { %5304 = vmatprep.subr.bf16.mxu0 %v5303_v42  ;;  %v1396_v62 = vand.u32 4294901760, %v5869_v58  ;;  %v1403_v63 = vand.u32 4294901760, %v1402_v59  ;;  %v5371_v14 = vpack.c.bf16 %v1819_v57, %v1816_v56  ;;  %v5930_v33 = vmul.f32 0.05, %v5791_v8 }
  0x4c   : > { %5328 = vmatprep.subr.bf16.mxu1 %v5327_v44  ;;  %5306 = vmatpush3.bf16.msra.mxu0 %v5303_v42  ;;  %v1905_v0 = vand.u32 4294901760, %v1904_v60  ;;  %v1912_v1 = vand.u32 4294901760, %v1911_v61  ;;  %v5379_v26 = vpack.c.bf16 %v1911_v61, %v1904_v60  ;;  %v5933_v37 = vmul.f32 0.05, %v5797_v10 }
  0x4d   : > { %5330 = vmatpush3.bf16.msra.mxu1 %v5327_v44  ;;  %5308 = vmatprep.subr.bf16.mxu0 %v5307_v43  ;;  %v1397_v3 = vsub.f32 %v5869_v58, %v1396_v62  ;;  %v1404_v13 = vsub.f32 %v1402_v59, %v1403_v63 }
  0x4e   : > { %5332 = vmatprep.subr.bf16.mxu1 %v5331_v45  ;;  %v1906_v16 = vsub.f32 %v1904_v60, %v1905_v0  ;;  %v1913_v17 = vsub.f32 %v1911_v61, %v1912_v1  ;;  %v5387_v28 = vpack.c.bf16 %v1912_v1, %v1905_v0 }
  0x4f   : > { %v1398_v18 = vand.u32 4294901760, %v1397_v3  ;;  %v1405_v19 = vand.u32 4294901760, %v1404_v13 }
  0x50   : > { %4975 = vmatmul.mubr.f32.vlgmr.msra.gmra.mrb[0].mxu0 %v5776_v5  ;;  %5017 = vmatmul.mubr.f32.vlgmr.msra.gmra.mrb[0].mxu1 %v5776_v5  ;;  %v1907_v20 = vand.u32 4294901760, %v1906_v16  ;;  %v1914_v21 = vand.u32 4294901760, %v1913_v17 }
  0x51   : > { %5310 = vmatpush3.bf16.msra.mxu0 %v5307_v43  ;;  %5334 = vmatpush3.bf16.msra.mxu1 %v5331_v45  ;;  %v5351_v22 = vpack.c.bf16 %v1405_v19, %v1398_v18 }
  0x52   : > { %4981 = vmatprep.mubr.f32.mxu0 %v5780_v6  ;;  %5023 = vmatprep.mubr.f32.mxu1 %v5780_v6  ;;  %v5375_v23 = vpack.c.bf16 %v1914_v21, %v1907_v20 }
  0x53   : > { %5312 = vmatprep.subr.bf16.mxu0 %v5820_v24  ;;  %5336 = vmatprep.subr.bf16.mxu1 %v5824_v27 }
  0x58   : > { %4982 = vmatmul.mubr.f32.vlgmr.msra.gmra.mrb[0].mxu0 %v5783_v7  ;;  %5024 = vmatmul.mubr.f32.vlgmr.msra.gmra.mrb[0].mxu1 %v5783_v7 }
  0x59   : > { %5314 = vmatpush3.bf16.msra.mxu0 %v5820_v24  ;;  %5338 = vmatpush3.bf16.msra.mxu1 %v5824_v27 }
  0x5a   : > { %4988 = vmatprep.mubr.f32.mxu0 %v5800_v11  ;;  %5030 = vmatprep.mubr.f32.mxu1 %v5800_v11 }
  0x5b   : > { %5316 = vmatprep.subr.bf16.mxu0 %v5315_v48  ;;  %5340 = vmatprep.subr.bf16.mxu1 %v5339_v49 }
  0x60   : > { %4989 = vmatmul.mubr.f32.vlgmr.msra.gmra.mrb[0].mxu0 %v5803_v12  ;;  %5031 = vmatmul.mubr.f32.vlgmr.msra.gmra.mrb[0].mxu1 %v5803_v12 }
  0x61   : > { %5318 = vmatpush3.bf16.msra.mxu0 %v5315_v48  ;;  %5342 = vmatpush3.bf16.msra.mxu1 %v5339_v49 }
  0x62   : > { %4995 = vmatprep.mubr.f32.mxu0 %v5774_v4  ;;  %5037 = vmatprep.mubr.f32.mxu1 %v5774_v4 }
  0x63   : > { %5320 = vmatprep.subr.bf16.mxu0 %v5820_v24  ;;  %5344 = vmatprep.subr.bf16.mxu1 %v5824_v27 }
  0x68   : > { %4996 = vmatmul.mubr.f32.vlgmr.msra.gmra.mrb[0].mxu0 %v5776_v5  ;;  %5038 = vmatmul.mubr.f32.vlgmr.msra.gmra.mrb[0].mxu1 %v5776_v5 }
  0x69   : > { %5322 = vmatpush3.bf16.msra.mxu0 %v5820_v24  ;;  %5346 = vmatpush3.bf16.msra.mxu1 %v5824_v27  ;;  %v5355_v24 = vpack.c.bf16 %v1402_v59, %v5869_v58  ;;  %v5363_v27 = vpack.c.bf16 %v1403_v63, %v1396_v62 }
  0x6a   : > { %5002 = vmatprep.mubr.f32.mxu0 %v5774_v4  ;;  %5044 = vmatprep.mubr.f32.mxu1 %v5774_v4 }
  0x6b   : > { %5348 = vmatprep.subr.bf16.mxu0 %v5879_v2  ;;  %5372 = vmatprep.subr.bf16.mxu1 %v5371_v14 }
  0x70   : > { %5003 = vmatmul.mubr.f32.vlgmr.msra.gmra.mrb[0].mxu0 %v5776_v5  ;;  %5045 = vmatmul.mubr.f32.vlgmr.msra.gmra.mrb[0].mxu1 %v5776_v5 }
  0x71   : > { %5350 = vmatpush3.bf16.msra.mxu0 %v5879_v2  ;;  %5374 = vmatpush3.bf16.msra.mxu1 %v5371_v14 }
  0x72   : > { %5051 = vmatprep.mubr.f32.mxu0 %v5822_v25  ;;  %5093 = vmatprep.mubr.f32.mxu1 %v5822_v25 }
  0x73   : > { %5352 = vmatprep.subr.bf16.mxu0 %v5351_v22  ;;  %5376 = vmatprep.subr.bf16.mxu1 %v5375_v23 }
  0x74   : > { %5052 = vmatmul.mubr.f32.vlgmr.msra.gmra.mrb[2].mxu0 %v5828_v31  ;;  %5094 = vmatmul.mubr.f32.vlgmr.msra.gmra.mrb[2].mxu1 %v5828_v31 }
  0x75   : > { %5354 = vmatpush3.bf16.msra.mxu0 %v5351_v22  ;;  %5378 = vmatpush3.bf16.msra.mxu1 %v5375_v23  ;;  %v5972_v22 = vmul.f32 0.05, %v5845_v46 }
  0x76   : > { %5058 = vmatprep.mubr.f32.mxu0 %v5774_v4  ;;  %5100 = vmatprep.mubr.f32.mxu1 %v5774_v4 }
  0x77   : > { %5356 = vmatprep.subr.bf16.mxu0 %v5355_v24  ;;  %5380 = vmatprep.subr.bf16.mxu1 %v5379_v26 }
  0x7c   : > { %5059 = vmatmul.mubr.f32.vlgmr.msra.gmra.mrb[2].mxu0 %v5776_v5  ;;  %5101 = vmatmul.mubr.f32.vlgmr.msra.gmra.mrb[2].mxu1 %v5776_v5 }
  0x7d   : > { %5358 = vmatpush3.bf16.msra.mxu0 %v5355_v24  ;;  %5382 = vmatpush3.bf16.msra.mxu1 %v5379_v26  ;;  %v5975_v24 = vmul.f32 0.05, %v5848_v47  ;;  %v5978_v26 = vmul.f32 0.05, %v5852_v50 }
  0x7e   : > { %5065 = vmatprep.mubr.f32.mxu0 %v5780_v6  ;;  %5107 = vmatprep.mubr.f32.mxu1 %v5780_v6 }
  0x7f   : > { %5360 = vmatprep.subr.bf16.mxu0 %v5879_v2  ;;  %5384 = vmatprep.subr.bf16.mxu1 %v5371_v14 }
  0x84   : > { %5066 = vmatmul.mubr.f32.vlgmr.msra.gmra.mrb[2].mxu0 %v5783_v7  ;;  %5108 = vmatmul.mubr.f32.vlgmr.msra.gmra.mrb[2].mxu1 %v5783_v7 }
  0x85   : > { %5362 = vmatpush3.bf16.msra.mxu0 %v5879_v2  ;;  %5386 = vmatpush3.bf16.msra.mxu1 %v5371_v14 }
  0x86   : > { %5072 = vmatprep.mubr.f32.mxu0 %v5800_v11  ;;  %5114 = vmatprep.mubr.f32.mxu1 %v5800_v11 }
  0x87   : > { %5364 = vmatprep.subr.bf16.mxu0 %v5363_v27  ;;  %5388 = vmatprep.subr.bf16.mxu1 %v5387_v28 }
  0x8c   : > { %5073 = vmatmul.mubr.f32.vlgmr.msra.gmra.mrb[2].mxu0 %v5803_v12  ;;  %5115 = vmatmul.mubr.f32.vlgmr.msra.gmra.mrb[2].mxu1 %v5803_v12 }
  0x8d   : > { %5366 = vmatpush3.bf16.msra.mxu0 %v5363_v27  ;;  %5390 = vmatpush3.bf16.msra.mxu1 %v5387_v28 }
  0x8e   : > { %5079 = vmatprep.mubr.f32.mxu0 %v5774_v4  ;;  %5121 = vmatprep.mubr.f32.mxu1 %v5774_v4 }
  0x8f   : > { %5368 = vmatprep.subr.bf16.mxu0 %v5879_v2  ;;  %5392 = vmatprep.subr.bf16.mxu1 %v5371_v14 }
  0x94   : > { %5080 = vmatmul.mubr.f32.vlgmr.msra.gmra.mrb[2].mxu0 %v5776_v5  ;;  %5122 = vmatmul.mubr.f32.vlgmr.msra.gmra.mrb[2].mxu1 %v5776_v5 }
  0x95   : > { %5370 = vmatpush3.bf16.msra.mxu0 %v5879_v2  ;;  %5394 = vmatpush3.bf16.msra.mxu1 %v5371_v14 }
  0x96   : > { %5086 = vmatprep.mubr.f32.mxu0 %v5774_v4  ;;  %5128 = vmatprep.mubr.f32.mxu1 %v5774_v4 }
  0x9c   : > { %5087 = vmatmul.mubr.f32.vlgmr.msra.gmra.mrb[2].mxu0 %v5776_v5  ;;  %5129 = vmatmul.mubr.f32.vlgmr.msra.gmra.mrb[2].mxu1 %v5776_v5 }
  0x9d   : > { %5135 = vmatprep.mubr.f32.mxu0 %v5822_v25  ;;  %5177 = vmatprep.mubr.f32.mxu1 %v5822_v25 }
 0x143   : > { %v5004_v30 = vpop.f32.mrb[0].mxu0  ;;  %v5046_v35 = vpop.f32.mrb[0].mxu1 }
 0x144   : > { %v791_v34 = vmul.f32 0.95, %v5004_v30  ;;  %v780_v36 = vpop.f32.mrb[1].mxu0  ;;  %v1300_v38 = vmul.f32 0.95, %v5046_v35  ;;  %v1289_v40 = vpop.f32.mrb[1].mxu1 }
 0x145   : > { %v790_v39 = vmul.f32 0.95, %v780_v36  ;;  %v1299_v9 = vmul.f32 0.95, %v1289_v40 }
 0x146   : > { %v793_v41 = vadd.f32 %v791_v34, %v5924_v29  ;;  %v1302_v42 = vadd.f32 %v1300_v38, %v5927_v32  ;;  %v5981_v34 = vmul.f32 0.05, %v5859_v52 }
 0x147   : > { %v792_v15 = vadd.f32 %v790_v39, %v5930_v33  ;;  %v1301_v8 = vadd.f32 %v1299_v9, %v5933_v37 }
 0x148   : > { %v2322_v43 = vsel %vm284_vm1, %v793_v41, 0  ;;  %v2831_v45 = vsel %vm284_vm1, %v1302_v42, 0 }
 0x149   : > { %v2328_v44 = vand.u32 4294901760, %v2322_v43  ;;  %v2325_v48 = vand.u32 4294901760, %v792_v15  ;;  %v2837_v10 = vand.u32 4294901760, %v2831_v45  ;;  %v2834_v49 = vand.u32 4294901760, %v1301_v8 }
 0x14b   : > { %v2420_v51 = vsub.f32 %v2322_v43, %v2328_v44  ;;  %v5941_v53 = vpack.c.bf16 %v2328_v44, %v2325_v48  ;;  %v2413_v54 = vsub.f32 %v792_v15, %v2325_v48  ;;  %v2929_v55 = vsub.f32 %v2831_v45, %v2837_v10 }
 0x14c   : > { %v5943_v56 = vpack.c.bf16 %v2837_v10, %v2834_v49  ;;  %v2922_v57 = vsub.f32 %v1301_v8, %v2834_v49 }
 0x14d   : > { %5396 = vmatprep.subr.bf16.mxu0 %v5941_v53  ;;  %v2414_v58 = vand.u32 4294901760, %v2413_v54  ;;  %v2421_v59 = vand.u32 4294901760, %v2420_v51  ;;  %v5403_v60 = vpack.c.bf16 %v2420_v51, %v2413_v54  ;;  %v2930_v62 = vand.u32 4294901760, %v2929_v55 }
 0x14e   : > { %5420 = vmatprep.subr.bf16.mxu1 %v5943_v56  ;;  %5398 = vmatpush3.bf16.msra.mxu0 %v5941_v53  ;;  %v2923_v61 = vand.u32 4294901760, %v2922_v57  ;;  %v5427_v63 = vpack.c.bf16 %v2929_v55, %v2922_v57 }
 0x14f   : > { %5422 = vmatpush3.bf16.msra.mxu1 %v5943_v56  ;;  %v2415_v0 = vsub.f32 %v2413_v54, %v2414_v58  ;;  %v2422_v1 = vsub.f32 %v2420_v51, %v2421_v59  ;;  %v5411_v2 = vpack.c.bf16 %v2421_v59, %v2414_v58  ;;  %v2931_v13 = vsub.f32 %v2929_v55, %v2930_v62 }
 0x150   : > { %v2924_v3 = vsub.f32 %v2922_v57, %v2923_v61  ;;  %v5435_v14 = vpack.c.bf16 %v2930_v62, %v2923_v61 }
 0x151   : > { %5136 = vmatmul.mubr.f32.vlgmr.msra.gmra.mrb[4].mxu0 %v5828_v31  ;;  %v2416_v16 = vand.u32 4294901760, %v2415_v0  ;;  %v2423_v17 = vand.u32 4294901760, %v2422_v1  ;;  %v2932_v19 = vand.u32 4294901760, %v2931_v13 }
 0x152   : > { %5178 = vmatmul.mubr.f32.vlgmr.msra.gmra.mrb[4].mxu1 %v5828_v31  ;;  %v2925_v18 = vand.u32 4294901760, %v2924_v3  ;;  %5142 = vmatprep.mubr.f32.mxu0 %v5774_v4 }
 0x153   : > { %v5399_v20 = vpack.c.bf16 %v2423_v17, %v2416_v16  ;;  %5184 = vmatprep.mubr.f32.mxu1 %v5774_v4  ;;  %v4386_v17 = vstv %s6051_s26  ;;  %s6147_s26 = sld [smem:[#allocation2 + $0x283]] }
 0x154   : > { %v5423_v21 = vpack.c.bf16 %v2932_v19, %v2925_v18  ;;  %v4390_v19 = vstv %s6053_s27  ;;  %s6149_s27 = sld [smem:[#allocation2 + $0x303]] }
 0x155   : > { %5400 = vmatprep.subr.bf16.mxu0 %v5399_v20 }
 0x156   : > { %5424 = vmatprep.subr.bf16.mxu1 %v5423_v21  ;;  %5402 = vmatpush3.bf16.msra.mxu0 %v5399_v20  ;;  %v4396_v20 = vstv %s6055_s28  ;;  %s6151_s28 = sld [smem:[#allocation2 + $0x383]] }
 0x157   : > { %5426 = vmatpush3.bf16.msra.mxu1 %v5423_v21  ;;  %5404 = vmatprep.subr.bf16.mxu0 %v5403_v60 }
 0x158   : > { %5428 = vmatprep.subr.bf16.mxu1 %v5427_v63 }
 0x159   : > { %5143 = vmatmul.mubr.f32.vlgmr.msra.gmra.mrb[4].mxu0 %v5776_v5 }
 0x15a   : > { %5185 = vmatmul.mubr.f32.vlgmr.msra.gmra.mrb[4].mxu1 %v5776_v5  ;;  %5406 = vmatpush3.bf16.msra.mxu0 %v5403_v60 }
 0x15b   : > { %5430 = vmatpush3.bf16.msra.mxu1 %v5427_v63  ;;  %5408 = vmatprep.subr.bf16.mxu0 %v5941_v53 }
 0x15c   : > { %5432 = vmatprep.subr.bf16.mxu1 %v5943_v56  ;;  %5149 = vmatprep.mubr.f32.mxu0 %v5780_v6 }
 0x15d   : > { %5191 = vmatprep.mubr.f32.mxu1 %v5780_v6 }
 0x161   : > { %5150 = vmatmul.mubr.f32.vlgmr.msra.gmra.mrb[4].mxu0 %v5783_v7 }
 0x162   : > { %5410 = vmatpush3.bf16.msra.mxu0 %v5941_v53  ;;  %5192 = vmatmul.mubr.f32.vlgmr.msra.gmra.mrb[4].mxu1 %v5783_v7 }
 0x163   : > { %5434 = vmatpush3.bf16.msra.mxu1 %v5943_v56  ;;  %5412 = vmatprep.subr.bf16.mxu0 %v5411_v2 }
 0x164   : > { %5436 = vmatprep.subr.bf16.mxu1 %v5435_v14  ;;  %5156 = vmatprep.mubr.f32.mxu0 %v5800_v11 }
 0x165   : > { %5198 = vmatprep.mubr.f32.mxu1 %v5800_v11 }
 0x169   : > { %5157 = vmatmul.mubr.f32.vlgmr.msra.gmra.mrb[4].mxu0 %v5803_v12 }
 0x16a   : > { %5414 = vmatpush3.bf16.msra.mxu0 %v5411_v2  ;;  %5199 = vmatmul.mubr.f32.vlgmr.msra.gmra.mrb[4].mxu1 %v5803_v12 }
 0x16b   : > { %5438 = vmatpush3.bf16.msra.mxu1 %v5435_v14  ;;  %5416 = vmatprep.subr.bf16.mxu0 %v5941_v53 }
 0x16c   : > { %5440 = vmatprep.subr.bf16.mxu1 %v5943_v56  ;;  %5163 = vmatprep.mubr.f32.mxu0 %v5774_v4 }
 0x16d   : > { %5205 = vmatprep.mubr.f32.mxu1 %v5774_v4 }
 0x16f   : > { %v5088_v23 = vpop.f32.mrb[2].mxu0  ;;  %v5130_v28 = vpop.f32.mrb[2].mxu1 }
 0x170   : > { %v1809_v27 = vmul.f32 0.95, %v5088_v23  ;;  %v1798_v30 = vpop.f32.mrb[3].mxu0  ;;  %v2318_v35 = vmul.f32 0.95, %v5130_v28  ;;  %v2307_v38 = vpop.f32.mrb[3].mxu1  ;;  %v4408_v28 = vstv %s6059_s30 }
 0x171   : > { %v1808_v36 = vmul.f32 0.95, %v1798_v30  ;;  %5164 = vmatmul.mubr.f32.vlgmr.msra.gmra.mrb[4].mxu0 %v5776_v5  ;;  %v2317_v39 = vmul.f32 0.95, %v2307_v38  ;;  %v4414_v38 = vstv %s6061_s5  ;;  %s6155_s30 = sld [smem:[#allocation4 + $0x1]]  ;;  %s6157_s5 = sld [smem:[#allocation4 + $0x2]] }
 0x172   : > { %v1811_v46 = vadd.f32 %v1809_v27, %v5972_v22  ;;  %5418 = vmatpush3.bf16.msra.mxu0 %v5941_v53  ;;  %5206 = vmatmul.mubr.f32.vlgmr.msra.gmra.mrb[4].mxu1 %v5776_v5  ;;  %v2320_v47 = vadd.f32 %v2318_v35, %v5975_v24  ;;  %v4402_v27 = vstv %s6057_s29  ;;  %s6153_s29 = sld [smem:[#allocation4]] }
 0x173   : > { %v1810_v50 = vadd.f32 %v1808_v36, %v5978_v26  ;;  %5442 = vmatpush3.bf16.msra.mxu1 %v5943_v56  ;;  %5170 = vmatprep.mubr.f32.mxu0 %v5774_v4  ;;  %v2319_v40 = vadd.f32 %v2317_v39, %v5981_v34  ;;  %v4426_v39 = vstv %s6065_s7  ;;  %s6161_s7 = sld [smem:[#allocation4 + $0x4]] }
 0x174   : > { %v3340_v52 = vsel %vm284_vm1, %v1811_v46, 0  ;;  %5212 = vmatprep.mubr.f32.mxu1 %v5774_v4  ;;  %v3849_v9 = vsel %vm284_vm1, %v2320_v47, 0  ;;  %v4420_v46 = vstv %s6063_s6  ;;  %s6159_s6 = sld [smem:[#allocation4 + $0x3]] }
 0x175   : > { %v3346_v41 = vand.u32 4294901760, %v3340_v52  ;;  %v3343_v42 = vand.u32 4294901760, %v1810_v50  ;;  %v3855_v15 = vand.u32 4294901760, %v3849_v9  ;;  %v3852_v43 = vand.u32 4294901760, %v2319_v40 }
 0x177   : > { %v3438_v8 = vsub.f32 %v3340_v52, %v3346_v41  ;;  %v5995_v44 = vpack.c.bf16 %v3346_v41, %v3343_v42  ;;  %v3431_v45 = vsub.f32 %v1810_v50, %v3343_v42  ;;  %v3947_v48 = vsub.f32 %v3849_v9, %v3855_v15 }
 0x178   : > { %v5997_v10 = vpack.c.bf16 %v3855_v15, %v3852_v43  ;;  %v3940_v49 = vsub.f32 %v2319_v40, %v3852_v43  ;;  %v4432_v50 = vstv %s6067_s8  ;;  %s6163_s8 = sld [smem:[#allocation4 + $0x5]] }
 0x179   : > { %5171 = vmatmul.mubr.f32.vlgmr.msra.gmra.mrb[4].mxu0 %v5776_v5  ;;  %5444 = vmatprep.subr.bf16.mxu0 %v5995_v44  ;;  %v3432_v51 = vand.u32 4294901760, %v3431_v45  ;;  %v3439_v53 = vand.u32 4294901760, %v3438_v8  ;;  %v5451_v54 = vpack.c.bf16 %v3438_v8, %v3431_v45  ;;  %v3948_v56 = vand.u32 4294901760, %v3947_v48 }
 0x17a   : > { %5213 = vmatmul.mubr.f32.vlgmr.msra.gmra.mrb[4].mxu1 %v5776_v5  ;;  %5468 = vmatprep.subr.bf16.mxu1 %v5997_v10  ;;  %v3941_v55 = vand.u32 4294901760, %v3940_v49  ;;  %v5475_v57 = vpack.c.bf16 %v3947_v48, %v3940_v49 }
 0x17b   : > { %5446 = vmatpush3.bf16.msra.mxu0 %v5995_v44  ;;  %5470 = vmatpush3.bf16.msra.mxu1 %v5997_v10  ;;  %v3433_v58 = vsub.f32 %v3431_v45, %v3432_v51  ;;  %v3440_v59 = vsub.f32 %v3438_v8, %v3439_v53  ;;  %v5459_v60 = vpack.c.bf16 %v3439_v53, %v3432_v51 }
 0x17c   : > { %5219 = vmatprep.mubr.f32.mxu0 %v5822_v25  ;;  %5261 = vmatprep.mubr.f32.mxu1 %v5822_v25  ;;  %v3942_v61 = vsub.f32 %v3940_v49, %v3941_v55  ;;  %v3949_v62 = vsub.f32 %v3947_v48, %v3948_v56  ;;  %v5483_v63 = vpack.c.bf16 %v3948_v56, %v3941_v55  ;;  %v4378_v25 = vstv %s6047_s24  ;;  %s6143_s24 = sld [smem:[#allocation2 + $0x183]] }
 0x17d   : > { %v3434_v0 = vand.u32 4294901760, %v3433_v58  ;;  %v3441_v1 = vand.u32 4294901760, %v3440_v59 }
 0x17e   : > { %5220 = vmatmul.mubr.f32.vlgmr.msra.gmra.mrb[6].mxu0 %v5828_v31  ;;  %5262 = vmatmul.mubr.f32.vlgmr.msra.gmra.mrb[6].mxu1 %v5828_v31  ;;  %v3943_v2 = vand.u32 4294901760, %v3942_v61  ;;  %v3950_v3 = vand.u32 4294901760, %v3949_v62  ;;  %v4382_v31 = vstv %s6049_s25  ;;  %s6145_s25 = sld [smem:[#allocation2 + $0x203]] }
 0x17f   : > { %v5447_v13 = vpack.c.bf16 %v3441_v1, %v3434_v0  ;;  %5226 = vmatprep.mubr.f32.mxu0 %v5774_v4  ;;  %5268 = vmatprep.mubr.f32.mxu1 %v5774_v4 }
 0x180   : > { %v5471_v14 = vpack.c.bf16 %v3950_v3, %v3943_v2 }
 0x181   : > { %5448 = vmatprep.subr.bf16.mxu0 %v5447_v13 }
 0x182   : > { %5472 = vmatprep.subr.bf16.mxu1 %v5471_v14  ;;  %5450 = vmatpush3.bf16.msra.mxu0 %v5447_v13 }
 0x183   : > { %5474 = vmatpush3.bf16.msra.mxu1 %v5471_v14  ;;  %5452 = vmatprep.subr.bf16.mxu0 %v5451_v54 }
 0x184   : > { %5476 = vmatprep.subr.bf16.mxu1 %v5475_v57 }
 0x186   : > { %5227 = vmatmul.mubr.f32.vlgmr.msra.gmra.mrb[6].mxu0 %v5776_v5  ;;  %5269 = vmatmul.mubr.f32.vlgmr.msra.gmra.mrb[6].mxu1 %v5776_v5 }
 0x187   : > { %5454 = vmatpush3.bf16.msra.mxu0 %v5451_v54  ;;  %5478 = vmatpush3.bf16.msra.mxu1 %v5475_v57 }
 0x188   : > { %5456 = vmatprep.subr.bf16.mxu0 %v5995_v44  ;;  %5480 = vmatprep.subr.bf16.mxu1 %v5997_v10 }
 0x189   : > { %5233 = vmatprep.mubr.f32.mxu0 %v5780_v6  ;;  %5275 = vmatprep.mubr.f32.mxu1 %v5780_v6  ;;  %v4366_v6 = vstv %s6041_s21  ;;  %s6137_s21 = sld [smem:[#allocation2 + $0x3]] }
 0x18e   : > { %5234 = vmatmul.mubr.f32.vlgmr.msra.gmra.mrb[6].mxu0 %v5783_v7  ;;  %5276 = vmatmul.mubr.f32.vlgmr.msra.gmra.mrb[6].mxu1 %v5783_v7 }
 0x18f   : > { %5458 = vmatpush3.bf16.msra.mxu0 %v5995_v44  ;;  %5482 = vmatpush3.bf16.msra.mxu1 %v5997_v10 }
 0x190   : > { %5460 = vmatprep.subr.bf16.mxu0 %v5459_v60  ;;  %5484 = vmatprep.subr.bf16.mxu1 %v5483_v63 }
 0x191   : > { %5240 = vmatprep.mubr.f32.mxu0 %v5800_v11  ;;  %5282 = vmatprep.mubr.f32.mxu1 %v5800_v11  ;;  %v4370_v11 = vstv %s6043_s22  ;;  %s6139_s22 = sld [smem:[#allocation2 + $0x83]] }
 0x196   : > { %5241 = vmatmul.mubr.f32.vlgmr.msra.gmra.mrb[6].mxu0 %v5803_v12  ;;  %5283 = vmatmul.mubr.f32.vlgmr.msra.gmra.mrb[6].mxu1 %v5803_v12  ;;  %v4374_v12 = vstv %s6045_s23  ;;  %s6141_s23 = sld [smem:[#allocation2 + $0x103]] }
 0x197   : > { %5462 = vmatpush3.bf16.msra.mxu0 %v5459_v60  ;;  %5486 = vmatpush3.bf16.msra.mxu1 %v5483_v63 }
 0x198   : > { %5464 = vmatprep.subr.bf16.mxu0 %v5995_v44  ;;  %5488 = vmatprep.subr.bf16.mxu1 %v5997_v10 }
 0x199   : > { %5247 = vmatprep.mubr.f32.mxu0 %v5774_v4  ;;  %5289 = vmatprep.mubr.f32.mxu1 %v5774_v4 }
 0x19e   : > { %5248 = vmatmul.mubr.f32.vlgmr.msra.gmra.mrb[6].mxu0 %v5776_v5  ;;  %5290 = vmatmul.mubr.f32.vlgmr.msra.gmra.mrb[6].mxu1 %v5776_v5 }
 0x19f   : > { %5466 = vmatpush3.bf16.msra.mxu0 %v5995_v44  ;;  %5490 = vmatpush3.bf16.msra.mxu1 %v5997_v10 }
 0x1a0   : > { %5254 = vmatprep.mubr.f32.mxu0 %v5774_v4  ;;  %5296 = vmatprep.mubr.f32.mxu1 %v5774_v4  ;;  %v4358_v4 = vstv %s6037_s18  ;;  %s6133_s18 = sld [smem:[#allocation2 + $0x302]] }
 0x1a6   : > { %5255 = vmatmul.mubr.f32.vlgmr.msra.gmra.mrb[6].mxu0 %v5776_v5  ;;  %5297 = vmatmul.mubr.f32.vlgmr.msra.gmra.mrb[6].mxu1 %v5776_v5  ;;  %v4362_v5 = vstv %s6039_s20  ;;  %s6135_s20 = sld [smem:[#allocation2 + $0x382]] }
 0x24c   : > { %v5172_v7 = vpop.f32.mrb[4].mxu0 }
 0x24d   : > { %v2827_v16 = vmul.f32 0.95, %v5172_v7  ;;  %v5214_v18 = vpop.f32.mrb[4].mxu1  ;;  %v2816_v21 = vpop.f32.mrb[5].mxu0 }
 0x24e   : > { %v3336_v23 = vmul.f32 0.95, %v5214_v18  ;;  %v2826_v30 = vmul.f32 0.95, %v2816_v21  ;;  %v3325_v35 = vpop.f32.mrb[5].mxu1 }
 0x24f   : > { %v2829_v36 = vadd.f32 %v2827_v16, %v5924_v29  ;;  %v3335_v40 = vmul.f32 0.95, %v3325_v35 }
 0x250   : > { %v3338_v47 = vadd.f32 %v3336_v23, %v5927_v32  ;;  %v2828_v52 = vadd.f32 %v2826_v30, %v5930_v33 }
 0x251   : > { %v4360_v41 = vmul.f32 %v4358_v4, %v2829_v36  ;;  %v4364_v9 = vmul.f32 %v4362_v5, %v2829_v36  ;;  %v4368_v42 = vmul.f32 %v4366_v6, %v2829_v36  ;;  %v4372_v15 = vmul.f32 %v4370_v11, %v2829_v36 }
 0x252   : > { %v4376_v43 = vmul.f32 %v4374_v12, %v2829_v36  ;;  %v4380_v8 = vmul.f32 %v4378_v25, %v2829_v36  ;;  %v4384_v44 = vmul.f32 %v4382_v31, %v2829_v36  ;;  %v4388_v45 = vmul.f32 %v4386_v17, %v2829_v36 }
 0x253   : > { %v4392_v48 = vmul.f32 %v4390_v19, %v3338_v47  ;;  %v4398_v10 = vmul.f32 %v4396_v20, %v3338_v47  ;;  %v4404_v29 = vmul.f32 %v4402_v27, %v3338_v47  ;;  %v4410_v49 = vmul.f32 %v4408_v28, %v3338_v47 }
 0x254   : > { %v4416_v51 = vmul.f32 %v4414_v38, %v3338_v47  ;;  %v4422_v53 = vmul.f32 %v4420_v46, %v3338_v47  ;;  %v4428_v54 = vmul.f32 %v4426_v39, %v3338_v47  ;;  %v4434_v32 = vmul.f32 %v4432_v50, %v3338_v47 }
 0x255   : > { %v6088_v55 = vadd.f32 %v4392_v48, %v4360_v41  ;;  %v6090_v33 = vadd.f32 %v4398_v10, %v4364_v9  ;;  %v6092_v56 = vadd.f32 %v4404_v29, %v4368_v42  ;;  %v6094_v57 = vadd.f32 %v4410_v49, %v4372_v15 }
 0x256   : > { %v6096_v58 = vadd.f32 %v4416_v51, %v4376_v43  ;;  %v6098_v59 = vadd.f32 %v4422_v53, %v4380_v8  ;;  %v6100_v60 = vadd.f32 %v4428_v54, %v4384_v44  ;;  %v6102_v61 = vadd.f32 %v4434_v32, %v4388_v45 }
 0x257   : > { %v4359_v62 = vmul.f32 %v4358_v4, %v2828_v52  ;;  %v4363_v63 = vmul.f32 %v4362_v5, %v2828_v52  ;;  %v4367_v0 = vmul.f32 %v4366_v6, %v2828_v52  ;;  %v4371_v1 = vmul.f32 %v4370_v11, %v2828_v52 }
 0x258   : > { %v3337_v2 = vadd.f32 %v3335_v40, %v5933_v37  ;;  %v4375_v3 = vmul.f32 %v4374_v12, %v2828_v52  ;;  %v4379_v13 = vmul.f32 %v4378_v25, %v2828_v52  ;;  %v4383_v14 = vmul.f32 %v4382_v31, %v2828_v52 }
 0x259   : > { %v4387_v7 = vmul.f32 %v4386_v17, %v2828_v52  ;;  %v4438_v31 = vstv %s6121_s9  ;;  %v4444_v17 = vstv %s6123_s10  ;;  %v4498_v52 = vstv %s6141_s23 }
 0x25a   : > { %v4391_v16 = vmul.f32 %v4390_v19, %v3337_v2  ;;  %v4397_v18 = vmul.f32 %v4396_v20, %v3337_v2  ;;  %v4403_v21 = vmul.f32 %v4402_v27, %v3337_v2  ;;  %v4409_v23 = vmul.f32 %v4408_v28, %v3337_v2 }
 0x25b   : > { %v4415_v30 = vmul.f32 %v4414_v38, %v3337_v2  ;;  %v4421_v35 = vmul.f32 %v4420_v46, %v3337_v2  ;;  %v4427_v36 = vmul.f32 %v4426_v39, %v3337_v2  ;;  %v4433_v47 = vmul.f32 %v4432_v50, %v3337_v2 }
 0x25c   : > { %v6105_v41 = vadd.f32 %v4391_v16, %v4359_v62  ;;  %v6107_v4 = vadd.f32 %v4397_v18, %v4363_v63  ;;  %v6109_v5 = vadd.f32 %v4403_v21, %v4367_v0  ;;  %v6111_v6 = vadd.f32 %v4409_v23, %v4371_v1 }
 0x25d   : > { %v6113_v37 = vadd.f32 %v4415_v30, %v4375_v3  ;;  %v6115_v11 = vadd.f32 %v4421_v35, %v4379_v13  ;;  %v6117_v12 = vadd.f32 %v4427_v36, %v4383_v14  ;;  %v6119_v25 = vadd.f32 %v4433_v47, %v4387_v7 }
 0x25e   : > { %v4450_v19 = vstv %s6125_s11  ;;  %v4456_v20 = vstv %s6127_s12  ;;  %v4462_v27 = vstv %s6129_s13  ;;  %v4468_v28 = vstv %s6131_s14 }
 0x25f   : > { %v4474_v38 = vstv %s6133_s18  ;;  %v4480_v46 = vstv %s6135_s20  ;;  %v4486_v39 = vstv %s6137_s21  ;;  %v4492_v50 = vstv %s6139_s22 }
 0x260   : > { %v4504_v40 = vstv %s6143_s24  ;;  %v4510_v15 = vstv %s6145_s25  ;;  %v4516_v43 = vstv %s6147_s26  ;;  %v4522_v8 = vstv %s6149_s27 }
 0x261   : > { %v4528_v44 = vstv %s6151_s28  ;;  %v4534_v10 = vstv %s6153_s29  ;;  %v4542_v29 = vstv %s6155_s30  ;;  %v4549_v53 = vstv %s6157_s5 }
 0x262   : > { %v4556_v54 = vstv %s6159_s6  ;;  %v4563_v0 = vstv %s6161_s7  ;;  %v4570_v1 = vstv %s6163_s8  ;;  %v4577_v2 = vstv %s6165_s0 }
 0x263   : > { %v4584_v13 = vstv %s6167_s1 }
 0x279   : > { %v5256_v9 = vpop.f32.mrb[6].mxu0  ;;  %v5298_v42 = vpop.f32.mrb[6].mxu1 }
 0x27a   : > { %v3845_v45 = vmul.f32 0.95, %v5256_v9  ;;  %v4354_v48 = vmul.f32 0.95, %v5298_v42  ;;  %v3834_v49 = vpop.f32.mrb[7].mxu0  ;;  %v4343_v51 = vpop.f32.mrb[7].mxu1 }
 0x27b   : > { %v3844_v32 = vmul.f32 0.95, %v3834_v49  ;;  %v4353_v62 = vmul.f32 0.95, %v4343_v51 }
 0x27c   : > { %v3847_v63 = vadd.f32 %v3845_v45, %v5972_v22  ;;  %v4356_v3 = vadd.f32 %v4354_v48, %v5975_v24 }
 0x27d   : > { %v3846_v14 = vadd.f32 %v3844_v32, %v5978_v26  ;;  %v6197_v7 = vadd.f32 %v4353_v62, %v5981_v34 }
 0x27e   : > { %v4440_v16 = vmul.f32 %v4438_v31, %v3847_v63  ;;  %v4446_v18 = vmul.f32 %v4444_v17, %v3847_v63  ;;  %v4452_v22 = vmul.f32 %v4450_v19, %v3847_v63  ;;  %v4458_v21 = vmul.f32 %v4456_v20, %v3847_v63 }
 0x27f   : > { %v4464_v24 = vmul.f32 %v4462_v27, %v3847_v63  ;;  %v4470_v26 = vmul.f32 %v4468_v28, %v3847_v63  ;;  %v4476_v34 = vmul.f32 %v4474_v38, %v3847_v63  ;;  %v4482_v23 = vmul.f32 %v4480_v46, %v3847_v63 }
 0x280   : > { %v4442_v30 = vadd.f32 %v4440_v16, %v6088_v55  ;;  %v4448_v35 = vadd.f32 %v4446_v18, %v6090_v33  ;;  %v4454_v36 = vadd.f32 %v4452_v22, %v6092_v56  ;;  %v4460_v47 = vadd.f32 %v4458_v21, %v6094_v57 }
 0x281   : > { %v4466_v9 = vadd.f32 %v4464_v24, %v6096_v58  ;;  %v4472_v42 = vadd.f32 %v4470_v26, %v6098_v59  ;;  %v4478_v45 = vadd.f32 %v4476_v34, %v6100_v60  ;;  %v4484_v48 = vadd.f32 %v4482_v23, %v6102_v61 }
 0x282   : > { %v4488_v49 = vmul.f32 %v4486_v39, %v4356_v3  ;;  %v4494_v55 = vmul.f32 %v4492_v50, %v4356_v3  ;;  %v4500_v33 = vmul.f32 %v4498_v52, %v4356_v3  ;;  %v4506_v56 = vmul.f32 %v4504_v40, %v4356_v3 }
 0x283   : > { %v4512_v57 = vmul.f32 %v4510_v15, %v4356_v3  ;;  %v4518_v58 = vmul.f32 %v4516_v43, %v4356_v3  ;;  %v4524_v59 = vmul.f32 %v4522_v8, %v4356_v3  ;;  %v4530_v60 = vmul.f32 %v4528_v44, %v4356_v3 }
 0x284   : > { %v4490_v61 = vadd.f32 %v4488_v49, %v4442_v30  ;;  %v4496_v51 = vadd.f32 %v4494_v55, %v4448_v35  ;;  %v4502_v32 = vadd.f32 %v4500_v33, %v4454_v36  ;;  %v4508_v62 = vadd.f32 %v4506_v56, %v4460_v47 }
 0x285   : > { %v4514_v63 = vadd.f32 %v4512_v57, %v4466_v9  ;;  %v4520_v16 = vadd.f32 %v4518_v58, %v4472_v42  ;;  %v4526_v18 = vadd.f32 %v4524_v59, %v4478_v45  ;;  %v4532_v3 = vadd.f32 %v4530_v60, %v4484_v48 }
 0x286   : > { %v4536_v22 = vadd.f32 %v4534_v10, %v4490_v61  ;;  %v4544_v21 = vadd.f32 %v4542_v29, %v4496_v51  ;;  %v4551_v24 = vadd.f32 %v4549_v53, %v4502_v32  ;;  %v4558_v26 = vadd.f32 %v4556_v54, %v4508_v62 }
 0x287   : > { %v4565_v34 = vadd.f32 %v4563_v0, %v4514_v63  ;;  %v4572_v23 = vadd.f32 %v4570_v1, %v4520_v16  ;;  %v4579_v30 = vadd.f32 %v4577_v2, %v4526_v18  ;;  %v4586_v35 = vadd.f32 %v4584_v13, %v4532_v3 }
 0x288   : > { %4540 = vst.msk [vmem:[%s6243_s19 + $0x8] sm:$0x3] %vm4539_vm2, %v4536_v22  ;;  %4748 = vst.msk [vmem:[%s6243_s19 + $0x18] sm:$0x3] %vm4539_vm2, %v4544_v21  ;;  %v4439_v36 = vmul.f32 %v4438_v31, %v3846_v14  ;;  %v4445_v47 = vmul.f32 %v4444_v17, %v3846_v14  ;;  %v4451_v9 = vmul.f32 %v4450_v19, %v3846_v14 }
 0x289   : > { %4751 = vst.msk [vmem:[%s6243_s19 + $0x28] sm:$0x3] %vm4539_vm2, %v4551_v24  ;;  %4754 = vst.msk [vmem:[%s6243_s19 + $0x38] sm:$0x3] %vm4539_vm2, %v4558_v26  ;;  %v4457_v42 = vmul.f32 %v4456_v20, %v3846_v14  ;;  %v4463_v31 = vmul.f32 %v4462_v27, %v3846_v14  ;;  %v4469_v17 = vmul.f32 %v4468_v28, %v3846_v14 }
 0x28a   : > { %4757 = vst.msk [vmem:[%s6243_s19 + $0x48] sm:$0x3] %vm4539_vm2, %v4565_v34  ;;  %4760 = vst.msk [vmem:[%s6243_s19 + $0x58] sm:$0x3] %vm4539_vm2, %v4572_v23  ;;  %v4475_v19 = vmul.f32 %v4474_v38, %v3846_v14  ;;  %v4481_v20 = vmul.f32 %v4480_v46, %v3846_v14  ;;  %v4441_v45 = vadd.f32 %v4439_v36, %v6105_v41 }
 0x28b   : > { %4763 = vst.msk [vmem:[%s6243_s19 + $0x68] sm:$0x3] %vm4539_vm2, %v4579_v30  ;;  %4766 = vst.msk [vmem:[%s6243_s19 + $0x78] sm:$0x3] %vm4539_vm2, %v4586_v35  ;;  %v4447_v48 = vadd.f32 %v4445_v47, %v6107_v4  ;;  %v4453_v49 = vadd.f32 %v4451_v9, %v6109_v5  ;;  %v4459_v55 = vadd.f32 %v4457_v42, %v6111_v6 }
 0x28c   : > { %v4465_v27 = vadd.f32 %v4463_v31, %v6113_v37  ;;  %v4471_v33 = vadd.f32 %v4469_v17, %v6115_v11  ;;  %v4477_v28 = vadd.f32 %v4475_v19, %v6117_v12  ;;  %v4483_v38 = vadd.f32 %v4481_v20, %v6119_v25 }
 0x28d   : > { %v4487_v46 = vmul.f32 %v4486_v39, %v6197_v7  ;;  %v4493_v41 = vmul.f32 %v4492_v50, %v6197_v7  ;;  %v4499_v4 = vmul.f32 %v4498_v52, %v6197_v7  ;;  %v4505_v5 = vmul.f32 %v4504_v40, %v6197_v7 }
 0x28e   : > { %v4511_v6 = vmul.f32 %v4510_v15, %v6197_v7  ;;  %v4517_v37 = vmul.f32 %v4516_v43, %v6197_v7  ;;  %v4523_v11 = vmul.f32 %v4522_v8, %v6197_v7  ;;  %v4529_v12 = vmul.f32 %v4528_v44, %v6197_v7 }
 0x28f   : > { %v4489_v25 = vadd.f32 %v4487_v46, %v4441_v45  ;;  %v4495_v39 = vadd.f32 %v4493_v41, %v4447_v48  ;;  %v4501_v50 = vadd.f32 %v4499_v4, %v4453_v49  ;;  %v4507_v52 = vadd.f32 %v4505_v5, %v4459_v55 }
 0x290   : > { %v4513_v40 = vadd.f32 %v4511_v6, %v4465_v27  ;;  %v4519_v15 = vadd.f32 %v4517_v37, %v4471_v33  ;;  %v4525_v43 = vadd.f32 %v4523_v11, %v4477_v28  ;;  %v4531_v8 = vadd.f32 %v4529_v12, %v4483_v38 }
 0x291   : > { %v4535_v14 = vadd.f32 %v4534_v10, %v4489_v25  ;;  %v4543_v44 = vadd.f32 %v4542_v29, %v4495_v39  ;;  %v4550_v7 = vadd.f32 %v4549_v53, %v4501_v50  ;;  %v4557_v56 = vadd.f32 %v4556_v54, %v4507_v52 }
 0x292   : > { %v4564_v57 = vadd.f32 %v4563_v0, %v4513_v40  ;;  %v4571_v58 = vadd.f32 %v4570_v1, %v4519_v15  ;;  %v4578_v59 = vadd.f32 %v4577_v2, %v4525_v43  ;;  %v4585_v60 = vadd.f32 %v4584_v13, %v4531_v8 }
 0x293   : > { %4538 = vst.msk [vmem:[%s6243_s19] sm:$0xff] %vm4537_vm3, %v4535_v14  ;;  %4747 = vst.msk [vmem:[%s6243_s19 + $0x10] sm:$0xff] %vm4537_vm3, %v4543_v44 }
 0x294   : > { %4750 = vst.msk [vmem:[%s6243_s19 + $0x20] sm:$0xff] %vm4537_vm3, %v4550_v7  ;;  %4753 = vst.msk [vmem:[%s6243_s19 + $0x30] sm:$0xff] %vm4537_vm3, %v4557_v56 }
 0x295   : > { %4756 = vst.msk [vmem:[%s6243_s19 + $0x40] sm:$0xff] %vm4537_vm3, %v4564_v57  ;;  %4759 = vst.msk [vmem:[%s6243_s19 + $0x50] sm:$0xff] %vm4537_vm3, %v4571_v58 }
 0x296   : > { %4762 = vst.msk [vmem:[%s6243_s19 + $0x60] sm:$0xff] %vm4537_vm3, %v4578_v59  ;;  %4765 = vst.msk [vmem:[%s6243_s19 + $0x70] sm:$0xff] %vm4537_vm3, %v4585_v60 }
 0x297 PF: > { %s16_s17 = sadd.s32 1, %s5676_s17   ;;  %s6388_s0 = sld [smem:[#allocation8_spill]] }
 0x298   : > { %p13_p4 = scmp.ge.s32.totalorder %s16_s17, 4   ;;  %s6389_s15 = smov %s5672_s16 }
 0x29a   :  { %15 = sbr.rel (!%p13_p4) target bundleno = 8 (0x8), region = 85 }
 0x29d   : > { %s6390_s16 = smov %s6388_s0 }
 0x2a1   :  { %4617 = vsyncpa [#allocation3], 1 }
 0x2a2   :  { %4619 = vsyncpa [#allocation3 + $0x1], 1 }
 0x2a3   :  { %4620 = vsyncpa [#allocation5], 1 }

</bundles_post_ra>
